<compile_context>
chip_gen: v7x
topology: tpu7x:2x2x1
jax: 0.10.0
libtpu: 0.0.40
codegen_flags: <defaults>
</compile_context>

<pallas_src>
import math
import numpy as np

import jax
import jax.numpy as jnp
from jax import lax
from jax.experimental import pallas as pl
from jax.experimental.pallas import tpu as pltpu

FUSED_ORDER = ["WXT", "B_ALL", "WH2T", "WH3T", "WH4T",
               "T12H", "T12C", "T23H", "T23C", "T34H",
               "S12", "S23", "S34"]


# --------------------------------- kernel -----------------------------------
def fwd_lstm_kernel(spec_ref, wxt_ref, b_ref, wh2_ref, wh3_ref, wh4_ref,
                    t12h_ref, t12c_ref, t23h_ref, t23c_ref, t34h_ref,
                    s12_ref, s23_ref, s34_ref, out_ref):
    O = out_ref.shape[0]
    f32 = jnp.float32
    wdt = wxt_ref.dtype                      # weight storage dtype (bf16 default)

    # Batch lives on the LANE axis: spec tile is (I, bm).  One fused matmul gives
    # all four levels' x-gate contributions, (16*O, bm); level l occupies the
    # 4*O-aligned sublane block [4*O*l, 4*O*(l+1)).
    spec = spec_ref[...].astype(wdt)
    gx = jnp.dot(wxt_ref[...], spec, preferred_element_type=f32) + b_ref[...]

    def lstm_level(gates, c_prev):
        # gates: (4*O, bm), sublane-major gate layout [ i | f | o | g ]; within a
        # gate block, step s occupies rows [s*Hl, (s+1)*Hl).  One sigmoid covers
        # the contiguous i/f/o slab; all slices are 8-aligned sublane slices.
        sfo = jax.nn.sigmoid(gates[0:3 * O, :])
        i = sfo[0:O, :]
        o = sfo[2 * O:3 * O, :]
        g = jnp.tanh(gates[3 * O:4 * O, :])
        if c_prev is None:                   # level 1: zero initial state
            c = i * g
        else:
            c = sfo[O:2 * O, :] * c_prev + i * g
        return o * jnp.tanh(c), c

    def trans_level(h, c, th_ref, tc_ref, s_ref):
        # Folded conv1d(k=3,s=2,p=1) + child duplication, one (O,O) matrix per
        # path (no half-zero concat matmul), then a per-parent-block softmax whose
        # denominator is a 0/1 block-sum matmul.  No row-max shift: |h|<1, |c|<2
        # and <=3 conv taps of |w|<=1/sqrt(3) bound the logits (|y| <~ 3.5), so
        # exp cannot overflow; softmax is shift-invariant, so results match.
        # TODO(synk): for arbitrary trained conv weights re-introduce a constant
        # shift (or pl.debug_check) to guard exp against overflow.
        yh = jnp.dot(th_ref[...], h.astype(wdt), preferred_element_type=f32)
        yc = jnp.dot(tc_ref[...], c.astype(wdt), preferred_element_type=f32)
        eh = jnp.exp(yh)
        ec = jnp.exp(yc)
        dh = jnp.dot(s_ref[...], eh.astype(wdt), preferred_element_type=f32)
        dc = jnp.dot(s_ref[...], ec.astype(wdt), preferred_element_type=f32)
        return (eh * pl.reciprocal(dh, approx=True),
                ec * pl.reciprocal(dc, approx=True))

    # ---- level 1 (single step over the full spectrum, zero initial state)
    h, c = lstm_level(gx[0:4 * O, :], None)
    hp, cp = trans_level(h, c, t12h_ref, t12c_ref, s12_ref)
    # ---- level 2 (2 steps, fused)
    g2 = gx[4 * O:8 * O, :] + jnp.dot(wh2_ref[...], hp.astype(wdt),
                                      preferred_element_type=f32)
    h, c = lstm_level(g2, cp)
    hp, cp = trans_level(h, c, t23h_ref, t23c_ref, s23_ref)
    # ---- level 3 (4 steps, fused); bug-compatible: trans3_4h feeds BOTH hx3, cx3
    g3 = gx[8 * O:12 * O, :] + jnp.dot(wh3_ref[...], hp.astype(wdt),
                                       preferred_element_type=f32)
    h, c = lstm_level(g3, cp)
    hp, cp = trans_level(h, c, t34h_ref, t34h_ref, s34_ref)
    # ---- level 4 (8 steps, fused); module returns hx4, step-concatenated
    g4 = gx[12 * O:16 * O, :] + jnp.dot(wh4_ref[...], hp.astype(wdt),
                                        preferred_element_type=f32)
    h, _ = lstm_level(g4, cp)
    out_ref[...] = h                         # (O, bm): lane-dense, unmasked store


# --------------------------------- wrapper -----------------------------------
def _pick_batch_block(b_pad):
    """b_pad is a multiple of 128 (batch is the lane axis, so blocks must be
    128-multiples).  Keep >=2 grid steps (>=4 when there is room) so v7x's two
    TensorCores both get work and the spec DMA pipeline stays full, while letting
    blocks grow to amortize the ~0.35us per-grid-step overhead."""
    target = b_pad // 4 if b_pad >= 512 else b_pad // 2
    for cand in (2048, 1024, 512, 256, 128):
        if cand <= target and b_pad % cand == 0:
            return cand
    return b_pad


def fwd_lstm_pallas(spec, fused):
    B, I = spec.shape
    O = fused["WH2T"].shape[-1]

    # Batch-on-lanes: transpose and pad batch up to a multiple of 128 lanes.
    B_pad = ((B + 127) // 128) * 128
    spec_t = spec.astype(jnp.float32).T                       # (I, B)
    if B_pad != B:
        spec_t = jnp.pad(spec_t, ((0, 0), (0, B_pad - B)))    # zero rows are benign

    bm = _pick_batch_block(B_pad)
    grid = (B_pad // bm,)

    in_specs = [pl.BlockSpec((I, bm), lambda i: (0, i))]
    # constant index maps -> weights stay VMEM-resident across grid steps
    in_specs += [pl.BlockSpec(fused[name].shape, lambda i: (0, 0))
                 for name in FUSED_ORDER]
    out_spec = pl.BlockSpec((O, bm), lambda i: (0, i))

    weight_bytes = sum(int(np.prod(fused[n].shape)) * fused[n].dtype.itemsize
                       for n in FUSED_ORDER)
    io_tile_bytes = 4 * bm * (I + O)
    work_bytes = 4 * bm * 24 * O            # gx + live per-level intermediates
    vmem_needed = 2 * (weight_bytes + io_tile_bytes) + work_bytes
    vmem_limit = int(min(max(2 * vmem_needed, 32 << 20), 48 << 20))

    macs_per_row = I * 16 * O + 12 * O * O + 12 * O * O
    flops = 2 * B_pad * macs_per_row
    transcendentals = B_pad * O * 32
    bytes_accessed = weight_bytes + 4 * B_pad * (I + O)

    out_t = pl.pallas_call(
        fwd_lstm_kernel,
        out_shape=jax.ShapeDtypeStruct((O, B_pad), jnp.float32),
        grid=grid,
        in_specs=in_specs,
        out_specs=out_spec,
        compiler_params=pltpu.CompilerParams(
            dimension_semantics=("parallel",),
            vmem_limit_bytes=vmem_limit),
        cost_estimate=pl.CostEstimate(flops=flops,
                                      transcendentals=transcendentals,
                                      bytes_accessed=bytes_accessed),
    )(spec_t, *[fused[n] for n in FUSED_ORDER])

    return out_t[:, :B].T                                     # (B, O)


# ------------------------------ parameter glue -------------------------------
def conv_matrix(w3, L):
    """Fold Conv1d(1,1,k=3,stride=2,pad=1,bias=False) over a length-L row into an
    (L, L//2) matrix M such that y = x @ M."""
    M = np.zeros((L, L // 2), np.float32)
    for j in range(L // 2):
        for k in range(3):
            s = 2 * j + k - 1
            if 0 <= s < L:
                M[s, j] = float(w3[k])
    return M


def init_natural_params(key, input_dim, output_dim):
    """Per-cell parameters in torch layout (weights pre-transposed to (in, 4H))."""
    keys = jax.random.split(key, 32)
    ki = 0

    def u(shape, bound):
        nonlocal ki
        k = keys[ki]
        ki += 1
        return jax.random.uniform(k, shape, jnp.float32, -bound, bound)

    p = {}
    for l, n in zip((1, 2, 3, 4), (1, 2, 4, 8)):
        isz, hsz = input_dim // n, output_dim // n
        bound = 1.0 / math.sqrt(hsz)
        p[f"w{l}x"] = u((isz, 4 * hsz), bound)                  # weight_ih^T
        p[f"w{l}h"] = u((hsz, 4 * hsz), bound)                  # weight_hh^T
        p[f"b{l}"] = u((1, 4 * hsz), bound) + u((1, 4 * hsz), bound)

    cb = 1.0 / math.sqrt(3.0)
    conv_specs = [("m12h", output_dim), ("m12c", output_dim),
                  ("m23h", output_dim // 2), ("m23c", output_dim // 2),
                  ("m34h", output_dim // 4)]
    # TODO(synk): trans3_4c exists in the PyTorch module but is never used in forward.
    for name, L in conv_specs:
        w3 = np.asarray(u((3,), cb))
        p[name] = jnp.asarray(conv_matrix(w3, L))
    return p


def build_fused_params(nat, input_dim, output_dim, weight_dtype=jnp.bfloat16):
    """Build the transposed, block-diagonal, gate-regrouped matrices used by the
    batch-on-lanes kernel.  Gate row order per level is [i|f|o|g]; within a gate
    block step s occupies rows [s*Hl, (s+1)*Hl).  The trans matrices fold the
    stride-2 conv AND the duplication of each parent for its two children, so the
    softmax output lands already aligned with the next level's step layout."""
    I, O = input_dim, output_dim
    assert I % 8 == 0 and O % 8 == 0
    nat_np = {k: np.asarray(v, np.float32) for k, v in nat.items()}
    GATE_ORDER = (0, 1, 3, 2)          # regrouped [i,f,o,g] <- torch [i,f,g,o]

    WXT = np.zeros((16 * O, I), np.float32)
    BV = np.zeros((16 * O, 1), np.float32)
    fused = {}
    for lvl, (l, n) in enumerate(zip((1, 2, 3, 4), (1, 2, 4, 8))):
        Il, Hl = I // n, O // n
        wx = nat_np[f"w{l}x"]                     # (Il, 4*Hl) torch gate order
        wh = nat_np[f"w{l}h"]                     # (Hl, 4*Hl)
        b = nat_np[f"b{l}"].reshape(-1)
        WHT = np.zeros((4 * O, O), np.float32)
        base = 4 * O * lvl
        for s in range(n):
            for r, gt in enumerate(GATE_ORDER):
                r0 = r * O + s * Hl
                WXT[base + r0: base + r0 + Hl, s * Il:(s + 1) * Il] = \
                    wx[:, gt * Hl:(gt + 1) * Hl].T
                BV[base + r0: base + r0 + Hl, 0] = b[gt * Hl:(gt + 1) * Hl]
                WHT[r0: r0 + Hl, s * Hl:(s + 1) * Hl] = \
                    wh[:, gt * Hl:(gt + 1) * Hl].T
        if l >= 2:
            fused[f"WH{l}T"] = jnp.asarray(WHT, weight_dtype)
    fused["WXT"] = jnp.asarray(WXT, weight_dtype)
    fused["B_ALL"] = jnp.asarray(BV, jnp.float32)   # bias added elementwise in f32

    def trans_mats(mh, mc, Hl):
        # Split (O,O) matrices: yh = TH @ h, yc = TC @ c (child-duplicated conv),
        # and the shared 0/1 per-softmax-block sum matrix S (identical for h / c).
        Hn = Hl // 2
        n_next = O // Hn
        TH = np.zeros((O, O), np.float32)
        TC = np.zeros((O, O), np.float32)
        S = np.zeros((O, O), np.float32)
        for sp in range(n_next):
            p = sp // 2
            TH[sp * Hn:(sp + 1) * Hn, p * Hl:(p + 1) * Hl] = mh.T
            TC[sp * Hn:(sp + 1) * Hn, p * Hl:(p + 1) * Hl] = mc.T
            S[sp * Hn:(sp + 1) * Hn, sp * Hn:(sp + 1) * Hn] = 1.0
        return (jnp.asarray(TH, weight_dtype), jnp.asarray(TC, weight_dtype),
                jnp.asarray(S, weight_dtype))

    fused["T12H"], fused["T12C"], fused["S12"] = trans_mats(
        nat_np["m12h"], nat_np["m12c"], O)
    fused["T23H"], fused["T23C"], fused["S23"] = trans_mats(
        nat_np["m23h"], nat_np["m23c"], O // 2)
    # bug-compatible with the torch forward: trans3_4h is applied to BOTH hx3 and
    # cx3, so no separate T34C is needed (the kernel reuses T34H for the c path).
    fused["T34H"], _, fused["S34"] = trans_mats(
        nat_np["m34h"], nat_np["m34h"], O // 4)
    return fused


# ---------------------- pure-JAX reference (original structure) ---------------
def fwd_lstm_reference(spec, nat):
    HI = lax.Precision.HIGHEST

    def cell(x, h, c, wx, wh, b):
        H = wh.shape[0]
        g = jnp.dot(x, wx, precision=HI) + jnp.dot(h, wh, precision=HI) + b
        i = jax.nn.sigmoid(g[:, :H])
        f = jax.nn.sigmoid(g[:, H:2 * H])
        gg = jnp.tanh(g[:, 2 * H:3 * H])
        o = jax.nn.sigmoid(g[:, 3 * H:])
        c2 = f * c + i * gg
        return o * jnp.tanh(c2), c2

    def tr(x, m):
        return jax.nn.softmax(jnp.dot(x, m, precision=HI), axis=-1)

    B, I = spec.shape
    O = nat["w1h"].shape[0]
    z = jnp.zeros((B, O), jnp.float32)
    hx1, cx1 = cell(spec, z, z, nat["w1x"], nat["w1h"], nat["b1"])
    hb, cb = [tr(hx1, nat["m12h"])], [tr(cx1, nat["m12c"])]
    hb2, cb2 = [], []
    for i in range(2):
        x = spec[:, i * (I // 2):(i + 1) * (I // 2)]
        h2, c2 = cell(x, hb[i // 2], cb[i // 2], nat["w2x"], nat["w2h"], nat["b2"])
        hb2.append(tr(h2, nat["m23h"]))
        cb2.append(tr(c2, nat["m23c"]))
    hb3, cb3 = [], []
    for i in range(4):
        x = spec[:, i * (I // 4):(i + 1) * (I // 4)]
        h3, c3 = cell(x, hb2[i // 2], cb2[i // 2], nat["w3x"], nat["w3h"], nat["b3"])
        hb3.append(tr(h3, nat["m34h"]))
        cb3.append(tr(c3, nat["m34h"]))      # bug-compatible: trans3_4h for cx3 too
    outs = []
    for i in range(8):
        x = spec[:, i * (I // 8):(i + 1) * (I // 8)]
        h4, _ = cell(x, hb3[i // 2], cb3[i // 2], nat["w4x"], nat["w4h"], nat["b4"])
        outs.append(h4)
    return jnp.concatenate(outs, axis=-1)


# ---------------------------------- main -------------------------------------
if __name__ == "__main__":
    B, input_dim, output_dim = 2, 32, 32
    key = jax.random.PRNGKey(0)
    k_spec, k_par = jax.random.split(key)
    spec = jax.random.normal(k_spec, (B, input_dim), jnp.float32)

    nat = init_natural_params(k_par, input_dim, output_dim)
    fused = build_fused_params(nat, input_dim, output_dim)

    out = fwd_lstm_pallas(spec, fused)
    out = jax.block_until_ready(out)
    assert out.shape == (B, output_dim), out.shape

    ref = fwd_lstm_reference(spec, nat)
    # kernel uses bf16 weight storage, default-precision MXU passes, approx
    # reciprocal and no row-max shift; reference is HIGHEST precision -> allow
    # small numerical slack.
    if not np.allclose(np.asarray(out), np.asarray(ref), atol=2e-2, rtol=2e-2):
        raise SystemExit(
            f"mismatch: max abs err = {float(jnp.max(jnp.abs(out - ref)))}")
    print("KERNEL_OK")
</pallas_src>

<mosaic_0001>
module attributes {stable_mosaic.version = 11 : i64} {
  func.func @fwd_lstm_kernel(%arg0: i32, %arg1: memref<32x128xf32, #tpu.memory_space<vmem>>, %arg2: memref<512x32xbf16, #tpu.memory_space<vmem>>, %arg3: memref<512x1xf32, #tpu.memory_space<vmem>>, %arg4: memref<128x32xbf16, #tpu.memory_space<vmem>>, %arg5: memref<128x32xbf16, #tpu.memory_space<vmem>>, %arg6: memref<128x32xbf16, #tpu.memory_space<vmem>>, %arg7: memref<32x32xbf16, #tpu.memory_space<vmem>>, %arg8: memref<32x32xbf16, #tpu.memory_space<vmem>>, %arg9: memref<32x32xbf16, #tpu.memory_space<vmem>>, %arg10: memref<32x32xbf16, #tpu.memory_space<vmem>>, %arg11: memref<32x32xbf16, #tpu.memory_space<vmem>>, %arg12: memref<32x32xbf16, #tpu.memory_space<vmem>>, %arg13: memref<32x32xbf16, #tpu.memory_space<vmem>>, %arg14: memref<32x32xbf16, #tpu.memory_space<vmem>>, %arg15: memref<32x128xf32, #tpu.memory_space<vmem>>) attributes {dimension_semantics = [#tpu.dimension_semantics<parallel>], iteration_bounds = array<i64: 1>, scalar_prefetch = 0 : i64, scratch_operands = 0 : i64, tpu.core_type = #tpu.core_type<tc>, window_params = [{transform_indices = @transform_0, window_bounds = array<i64: 32, 128>}, {pipeline_mode = #tpu.pipeline_mode<synchronous>, transform_indices = @transform_1, window_bounds = array<i64: 512, 32>}, {pipeline_mode = #tpu.pipeline_mode<synchronous>, transform_indices = @transform_2, window_bounds = array<i64: 512, 1>}, {pipeline_mode = #tpu.pipeline_mode<synchronous>, transform_indices = @transform_3, window_bounds = array<i64: 128, 32>}, {pipeline_mode = #tpu.pipeline_mode<synchronous>, transform_indices = @transform_4, window_bounds = array<i64: 128, 32>}, {pipeline_mode = #tpu.pipeline_mode<synchronous>, transform_indices = @transform_5, window_bounds = array<i64: 128, 32>}, {pipeline_mode = #tpu.pipeline_mode<synchronous>, transform_indices = @transform_6, window_bounds = array<i64: 32, 32>}, {pipeline_mode = #tpu.pipeline_mode<synchronous>, transform_indices = @transform_7, window_bounds = array<i64: 32, 32>}, {pipeline_mode = #tpu.pipeline_mode<synchronous>, transform_indices = @transform_8, window_bounds = array<i64: 32, 32>}, {pipeline_mode = #tpu.pipeline_mode<synchronous>, transform_indices = @transform_9, window_bounds = array<i64: 32, 32>}, {pipeline_mode = #tpu.pipeline_mode<synchronous>, transform_indices = @transform_10, window_bounds = array<i64: 32, 32>}, {pipeline_mode = #tpu.pipeline_mode<synchronous>, transform_indices = @transform_11, window_bounds = array<i64: 32, 32>}, {pipeline_mode = #tpu.pipeline_mode<synchronous>, transform_indices = @transform_12, window_bounds = array<i64: 32, 32>}, {pipeline_mode = #tpu.pipeline_mode<synchronous>, transform_indices = @transform_13, window_bounds = array<i64: 32, 32>}, {transform_indices = @transform_14, window_bounds = array<i64: 32, 128>}]} {
    %c0 = arith.constant 0 : index
    %c0_0 = arith.constant 0 : index
    %0 = vector.load %arg1[%c0, %c0_0] : memref<32x128xf32, #tpu.memory_space<vmem>>, vector<32x128xf32>
    %1 = arith.truncf %0 : vector<32x128xf32> to vector<32x128xbf16>
    %c0_1 = arith.constant 0 : index
    %c0_2 = arith.constant 0 : index
    %2 = vector.load %arg2[%c0_1, %c0_2] : memref<512x32xbf16, #tpu.memory_space<vmem>>, vector<512x32xbf16>
    %cst = arith.constant dense<0.000000e+00> : vector<512x128xf32>
    %3 = tpu.matmul %2, %1, %cst {dimension_numbers = #tpu.dot_dimension_numbers<[1], [0], [0], [1], [0, 0, 1, 1], [], []>} : vector<512x32xbf16>, vector<32x128xbf16>, vector<512x128xf32> -> vector<512x128xf32>
    %c0_3 = arith.constant 0 : index
    %c0_4 = arith.constant 0 : index
    %4 = vector.load %arg3[%c0_3, %c0_4] : memref<512x1xf32, #tpu.memory_space<vmem>>, vector<512x1xf32>
    %5 = vector.broadcast %4 : vector<512x1xf32> to vector<512x128xf32>
    %6 = arith.addf %3, %5 : vector<512x128xf32>
    %7 = vector.extract_strided_slice %6 {offsets = [0, 0], sizes = [128, 128], strides = [1, 1]} : vector<512x128xf32> to vector<128x128xf32>
    %8 = vector.extract_strided_slice %7 {offsets = [0, 0], sizes = [96, 128], strides = [1, 1]} : vector<128x128xf32> to vector<96x128xf32>
    %9 = arith.negf %8 : vector<96x128xf32>
    %10 = math.exp %9 : vector<96x128xf32>
    %cst_5 = arith.constant 1.000000e+00 : f32
    %11 = vector.broadcast %cst_5 : f32 to vector<96x128xf32>
    %12 = arith.addf %11, %10 : vector<96x128xf32>
    %13 = arith.divf %11, %12 : vector<96x128xf32>
    %14 = vector.extract_strided_slice %13 {offsets = [0, 0], sizes = [32, 128], strides = [1, 1]} : vector<96x128xf32> to vector<32x128xf32>
    %15 = vector.extract_strided_slice %13 {offsets = [64, 0], sizes = [32, 128], strides = [1, 1]} : vector<96x128xf32> to vector<32x128xf32>
    %16 = vector.extract_strided_slice %7 {offsets = [96, 0], sizes = [32, 128], strides = [1, 1]} : vector<128x128xf32> to vector<32x128xf32>
    %17 = math.tanh %16 : vector<32x128xf32>
    %18 = arith.mulf %14, %17 : vector<32x128xf32>
    %19 = math.tanh %18 : vector<32x128xf32>
    %20 = arith.mulf %15, %19 : vector<32x128xf32>
    %c0_6 = arith.constant 0 : index
    %c0_7 = arith.constant 0 : index
    %21 = vector.load %arg7[%c0_6, %c0_7] : memref<32x32xbf16, #tpu.memory_space<vmem>>, vector<32x32xbf16>
    %22 = arith.truncf %20 : vector<32x128xf32> to vector<32x128xbf16>
    %cst_8 = arith.constant dense<0.000000e+00> : vector<32x128xf32>
    %23 = tpu.matmul %21, %22, %cst_8 {dimension_numbers = #tpu.dot_dimension_numbers<[1], [0], [0], [1], [0, 0, 1, 1], [], []>} : vector<32x32xbf16>, vector<32x128xbf16>, vector<32x128xf32> -> vector<32x128xf32>
    %c0_9 = arith.constant 0 : index
    %c0_10 = arith.constant 0 : index
    %24 = vector.load %arg8[%c0_9, %c0_10] : memref<32x32xbf16, #tpu.memory_space<vmem>>, vector<32x32xbf16>
    %25 = arith.truncf %18 : vector<32x128xf32> to vector<32x128xbf16>
    %cst_11 = arith.constant dense<0.000000e+00> : vector<32x128xf32>
    %26 = tpu.matmul %24, %25, %cst_11 {dimension_numbers = #tpu.dot_dimension_numbers<[1], [0], [0], [1], [0, 0, 1, 1], [], []>} : vector<32x32xbf16>, vector<32x128xbf16>, vector<32x128xf32> -> vector<32x128xf32>
    %27 = math.exp %23 : vector<32x128xf32>
    %28 = math.exp %26 : vector<32x128xf32>
    %c0_12 = arith.constant 0 : index
    %c0_13 = arith.constant 0 : index
    %29 = vector.load %arg12[%c0_12, %c0_13] : memref<32x32xbf16, #tpu.memory_space<vmem>>, vector<32x32xbf16>
    %30 = arith.truncf %27 : vector<32x128xf32> to vector<32x128xbf16>
    %cst_14 = arith.constant dense<0.000000e+00> : vector<32x128xf32>
    %31 = tpu.matmul %29, %30, %cst_14 {dimension_numbers = #tpu.dot_dimension_numbers<[1], [0], [0], [1], [0, 0, 1, 1], [], []>} : vector<32x32xbf16>, vector<32x128xbf16>, vector<32x128xf32> -> vector<32x128xf32>
    %c0_15 = arith.constant 0 : index
    %c0_16 = arith.constant 0 : index
    %32 = vector.load %arg12[%c0_15, %c0_16] : memref<32x32xbf16, #tpu.memory_space<vmem>>, vector<32x32xbf16>
    %33 = arith.truncf %28 : vector<32x128xf32> to vector<32x128xbf16>
    %cst_17 = arith.constant dense<0.000000e+00> : vector<32x128xf32>
    %34 = tpu.matmul %32, %33, %cst_17 {dimension_numbers = #tpu.dot_dimension_numbers<[1], [0], [0], [1], [0, 0, 1, 1], [], []>} : vector<32x32xbf16>, vector<32x128xbf16>, vector<32x128xf32> -> vector<32x128xf32>
    %35 = tpu.reciprocal %31 {approx = true} : vector<32x128xf32> -> vector<32x128xf32>
    %36 = arith.mulf %27, %35 : vector<32x128xf32>
    %37 = tpu.reciprocal %34 {approx = true} : vector<32x128xf32> -> vector<32x128xf32>
    %38 = arith.mulf %28, %37 : vector<32x128xf32>
    %39 = vector.extract_strided_slice %6 {offsets = [128, 0], sizes = [128, 128], strides = [1, 1]} : vector<512x128xf32> to vector<128x128xf32>
    %c0_18 = arith.constant 0 : index
    %c0_19 = arith.constant 0 : index
    %40 = vector.load %arg4[%c0_18, %c0_19] : memref<128x32xbf16, #tpu.memory_space<vmem>>, vector<128x32xbf16>
    %41 = arith.truncf %36 : vector<32x128xf32> to vector<32x128xbf16>
    %cst_20 = arith.constant dense<0.000000e+00> : vector<128x128xf32>
    %42 = tpu.matmul %40, %41, %cst_20 {dimension_numbers = #tpu.dot_dimension_numbers<[1], [0], [0], [1], [0, 0, 1, 1], [], []>} : vector<128x32xbf16>, vector<32x128xbf16>, vector<128x128xf32> -> vector<128x128xf32>
    %43 = arith.addf %39, %42 : vector<128x128xf32>
    %44 = vector.extract_strided_slice %43 {offsets = [0, 0], sizes = [96, 128], strides = [1, 1]} : vector<128x128xf32> to vector<96x128xf32>
    %45 = arith.negf %44 : vector<96x128xf32>
    %46 = math.exp %45 : vector<96x128xf32>
    %cst_21 = arith.constant 1.000000e+00 : f32
    %47 = vector.broadcast %cst_21 : f32 to vector<96x128xf32>
    %48 = arith.addf %47, %46 : vector<96x128xf32>
    %49 = arith.divf %47, %48 : vector<96x128xf32>
    %50 = vector.extract_strided_slice %49 {offsets = [0, 0], sizes = [32, 128], strides = [1, 1]} : vector<96x128xf32> to vector<32x128xf32>
    %51 = vector.extract_strided_slice %49 {offsets = [64, 0], sizes = [32, 128], strides = [1, 1]} : vector<96x128xf32> to vector<32x128xf32>
    %52 = vector.extract_strided_slice %43 {offsets = [96, 0], sizes = [32, 128], strides = [1, 1]} : vector<128x128xf32> to vector<32x128xf32>
    %53 = math.tanh %52 : vector<32x128xf32>
    %54 = vector.extract_strided_slice %49 {offsets = [32, 0], sizes = [32, 128], strides = [1, 1]} : vector<96x128xf32> to vector<32x128xf32>
    %55 = arith.mulf %54, %38 : vector<32x128xf32>
    %56 = arith.mulf %50, %53 : vector<32x128xf32>
    %57 = arith.addf %55, %56 : vector<32x128xf32>
    %58 = math.tanh %57 : vector<32x128xf32>
    %59 = arith.mulf %51, %58 : vector<32x128xf32>
    %c0_22 = arith.constant 0 : index
    %c0_23 = arith.constant 0 : index
    %60 = vector.load %arg9[%c0_22, %c0_23] : memref<32x32xbf16, #tpu.memory_space<vmem>>, vector<32x32xbf16>
    %61 = arith.truncf %59 : vector<32x128xf32> to vector<32x128xbf16>
    %cst_24 = arith.constant dense<0.000000e+00> : vector<32x128xf32>
    %62 = tpu.matmul %60, %61, %cst_24 {dimension_numbers = #tpu.dot_dimension_numbers<[1], [0], [0], [1], [0, 0, 1, 1], [], []>} : vector<32x32xbf16>, vector<32x128xbf16>, vector<32x128xf32> -> vector<32x128xf32>
    %c0_25 = arith.constant 0 : index
    %c0_26 = arith.constant 0 : index
    %63 = vector.load %arg10[%c0_25, %c0_26] : memref<32x32xbf16, #tpu.memory_space<vmem>>, vector<32x32xbf16>
    %64 = arith.truncf %57 : vector<32x128xf32> to vector<32x128xbf16>
    %cst_27 = arith.constant dense<0.000000e+00> : vector<32x128xf32>
    %65 = tpu.matmul %63, %64, %cst_27 {dimension_numbers = #tpu.dot_dimension_numbers<[1], [0], [0], [1], [0, 0, 1, 1], [], []>} : vector<32x32xbf16>, vector<32x128xbf16>, vector<32x128xf32> -> vector<32x128xf32>
    %66 = math.exp %62 : vector<32x128xf32>
    %67 = math.exp %65 : vector<32x128xf32>
    %c0_28 = arith.constant 0 : index
    %c0_29 = arith.constant 0 : index
    %68 = vector.load %arg13[%c0_28, %c0_29] : memref<32x32xbf16, #tpu.memory_space<vmem>>, vector<32x32xbf16>
    %69 = arith.truncf %66 : vector<32x128xf32> to vector<32x128xbf16>
    %cst_30 = arith.constant dense<0.000000e+00> : vector<32x128xf32>
    %70 = tpu.matmul %68, %69, %cst_30 {dimension_numbers = #tpu.dot_dimension_numbers<[1], [0], [0], [1], [0, 0, 1, 1], [], []>} : vector<32x32xbf16>, vector<32x128xbf16>, vector<32x128xf32> -> vector<32x128xf32>
    %c0_31 = arith.constant 0 : index
    %c0_32 = arith.constant 0 : index
    %71 = vector.load %arg13[%c0_31, %c0_32] : memref<32x32xbf16, #tpu.memory_space<vmem>>, vector<32x32xbf16>
    %72 = arith.truncf %67 : vector<32x128xf32> to vector<32x128xbf16>
    %cst_33 = arith.constant dense<0.000000e+00> : vector<32x128xf32>
    %73 = tpu.matmul %71, %72, %cst_33 {dimension_numbers = #tpu.dot_dimension_numbers<[1], [0], [0], [1], [0, 0, 1, 1], [], []>} : vector<32x32xbf16>, vector<32x128xbf16>, vector<32x128xf32> -> vector<32x128xf32>
    %74 = tpu.reciprocal %70 {approx = true} : vector<32x128xf32> -> vector<32x128xf32>
    %75 = arith.mulf %66, %74 : vector<32x128xf32>
    %76 = tpu.reciprocal %73 {approx = true} : vector<32x128xf32> -> vector<32x128xf32>
    %77 = arith.mulf %67, %76 : vector<32x128xf32>
    %78 = vector.extract_strided_slice %6 {offsets = [256, 0], sizes = [128, 128], strides = [1, 1]} : vector<512x128xf32> to vector<128x128xf32>
    %c0_34 = arith.constant 0 : index
    %c0_35 = arith.constant 0 : index
    %79 = vector.load %arg5[%c0_34, %c0_35] : memref<128x32xbf16, #tpu.memory_space<vmem>>, vector<128x32xbf16>
    %80 = arith.truncf %75 : vector<32x128xf32> to vector<32x128xbf16>
    %cst_36 = arith.constant dense<0.000000e+00> : vector<128x128xf32>
    %81 = tpu.matmul %79, %80, %cst_36 {dimension_numbers = #tpu.dot_dimension_numbers<[1], [0], [0], [1], [0, 0, 1, 1], [], []>} : vector<128x32xbf16>, vector<32x128xbf16>, vector<128x128xf32> -> vector<128x128xf32>
    %82 = arith.addf %78, %81 : vector<128x128xf32>
    %83 = vector.extract_strided_slice %82 {offsets = [0, 0], sizes = [96, 128], strides = [1, 1]} : vector<128x128xf32> to vector<96x128xf32>
    %84 = arith.negf %83 : vector<96x128xf32>
    %85 = math.exp %84 : vector<96x128xf32>
    %cst_37 = arith.constant 1.000000e+00 : f32
    %86 = vector.broadcast %cst_37 : f32 to vector<96x128xf32>
    %87 = arith.addf %86, %85 : vector<96x128xf32>
    %88 = arith.divf %86, %87 : vector<96x128xf32>
    %89 = vector.extract_strided_slice %88 {offsets = [0, 0], sizes = [32, 128], strides = [1, 1]} : vector<96x128xf32> to vector<32x128xf32>
    %90 = vector.extract_strided_slice %88 {offsets = [64, 0], sizes = [32, 128], strides = [1, 1]} : vector<96x128xf32> to vector<32x128xf32>
    %91 = vector.extract_strided_slice %82 {offsets = [96, 0], sizes = [32, 128], strides = [1, 1]} : vector<128x128xf32> to vector<32x128xf32>
    %92 = math.tanh %91 : vector<32x128xf32>
    %93 = vector.extract_strided_slice %88 {offsets = [32, 0], sizes = [32, 128], strides = [1, 1]} : vector<96x128xf32> to vector<32x128xf32>
    %94 = arith.mulf %93, %77 : vector<32x128xf32>
    %95 = arith.mulf %89, %92 : vector<32x128xf32>
    %96 = arith.addf %94, %95 : vector<32x128xf32>
    %97 = math.tanh %96 : vector<32x128xf32>
    %98 = arith.mulf %90, %97 : vector<32x128xf32>
    %c0_38 = arith.constant 0 : index
    %c0_39 = arith.constant 0 : index
    %99 = vector.load %arg11[%c0_38, %c0_39] : memref<32x32xbf16, #tpu.memory_space<vmem>>, vector<32x32xbf16>
    %100 = arith.truncf %98 : vector<32x128xf32> to vector<32x128xbf16>
    %cst_40 = arith.constant dense<0.000000e+00> : vector<32x128xf32>
    %101 = tpu.matmul %99, %100, %cst_40 {dimension_numbers = #tpu.dot_dimension_numbers<[1], [0], [0], [1], [0, 0, 1, 1], [], []>} : vector<32x32xbf16>, vector<32x128xbf16>, vector<32x128xf32> -> vector<32x128xf32>
    %c0_41 = arith.constant 0 : index
    %c0_42 = arith.constant 0 : index
    %102 = vector.load %arg11[%c0_41, %c0_42] : memref<32x32xbf16, #tpu.memory_space<vmem>>, vector<32x32xbf16>
    %103 = arith.truncf %96 : vector<32x128xf32> to vector<32x128xbf16>
    %cst_43 = arith.constant dense<0.000000e+00> : vector<32x128xf32>
    %104 = tpu.matmul %102, %103, %cst_43 {dimension_numbers = #tpu.dot_dimension_numbers<[1], [0], [0], [1], [0, 0, 1, 1], [], []>} : vector<32x32xbf16>, vector<32x128xbf16>, vector<32x128xf32> -> vector<32x128xf32>
    %105 = math.exp %101 : vector<32x128xf32>
    %106 = math.exp %104 : vector<32x128xf32>
    %c0_44 = arith.constant 0 : index
    %c0_45 = arith.constant 0 : index
    %107 = vector.load %arg14[%c0_44, %c0_45] : memref<32x32xbf16, #tpu.memory_space<vmem>>, vector<32x32xbf16>
    %108 = arith.truncf %105 : vector<32x128xf32> to vector<32x128xbf16>
    %cst_46 = arith.constant dense<0.000000e+00> : vector<32x128xf32>
    %109 = tpu.matmul %107, %108, %cst_46 {dimension_numbers = #tpu.dot_dimension_numbers<[1], [0], [0], [1], [0, 0, 1, 1], [], []>} : vector<32x32xbf16>, vector<32x128xbf16>, vector<32x128xf32> -> vector<32x128xf32>
    %c0_47 = arith.constant 0 : index
    %c0_48 = arith.constant 0 : index
    %110 = vector.load %arg14[%c0_47, %c0_48] : memref<32x32xbf16, #tpu.memory_space<vmem>>, vector<32x32xbf16>
    %111 = arith.truncf %106 : vector<32x128xf32> to vector<32x128xbf16>
    %cst_49 = arith.constant dense<0.000000e+00> : vector<32x128xf32>
    %112 = tpu.matmul %110, %111, %cst_49 {dimension_numbers = #tpu.dot_dimension_numbers<[1], [0], [0], [1], [0, 0, 1, 1], [], []>} : vector<32x32xbf16>, vector<32x128xbf16>, vector<32x128xf32> -> vector<32x128xf32>
    %113 = tpu.reciprocal %109 {approx = true} : vector<32x128xf32> -> vector<32x128xf32>
    %114 = arith.mulf %105, %113 : vector<32x128xf32>
    %115 = tpu.reciprocal %112 {approx = true} : vector<32x128xf32> -> vector<32x128xf32>
    %116 = arith.mulf %106, %115 : vector<32x128xf32>
    %117 = vector.extract_strided_slice %6 {offsets = [384, 0], sizes = [128, 128], strides = [1, 1]} : vector<512x128xf32> to vector<128x128xf32>
    %c0_50 = arith.constant 0 : index
    %c0_51 = arith.constant 0 : index
    %118 = vector.load %arg6[%c0_50, %c0_51] : memref<128x32xbf16, #tpu.memory_space<vmem>>, vector<128x32xbf16>
    %119 = arith.truncf %114 : vector<32x128xf32> to vector<32x128xbf16>
    %cst_52 = arith.constant dense<0.000000e+00> : vector<128x128xf32>
    %120 = tpu.matmul %118, %119, %cst_52 {dimension_numbers = #tpu.dot_dimension_numbers<[1], [0], [0], [1], [0, 0, 1, 1], [], []>} : vector<128x32xbf16>, vector<32x128xbf16>, vector<128x128xf32> -> vector<128x128xf32>
    %121 = arith.addf %117, %120 : vector<128x128xf32>
    %122 = vector.extract_strided_slice %121 {offsets = [0, 0], sizes = [96, 128], strides = [1, 1]} : vector<128x128xf32> to vector<96x128xf32>
    %123 = arith.negf %122 : vector<96x128xf32>
    %124 = math.exp %123 : vector<96x128xf32>
    %cst_53 = arith.constant 1.000000e+00 : f32
    %125 = vector.broadcast %cst_53 : f32 to vector<96x128xf32>
    %126 = arith.addf %125, %124 : vector<96x128xf32>
    %127 = arith.divf %125, %126 : vector<96x128xf32>
    %128 = vector.extract_strided_slice %127 {offsets = [0, 0], sizes = [32, 128], strides = [1, 1]} : vector<96x128xf32> to vector<32x128xf32>
    %129 = vector.extract_strided_slice %127 {offsets = [64, 0], sizes = [32, 128], strides = [1, 1]} : vector<96x128xf32> to vector<32x128xf32>
    %130 = vector.extract_strided_slice %121 {offsets = [96, 0], sizes = [32, 128], strides = [1, 1]} : vector<128x128xf32> to vector<32x128xf32>
    %131 = math.tanh %130 : vector<32x128xf32>
    %132 = vector.extract_strided_slice %127 {offsets = [32, 0], sizes = [32, 128], strides = [1, 1]} : vector<96x128xf32> to vector<32x128xf32>
    %133 = arith.mulf %132, %116 : vector<32x128xf32>
    %134 = arith.mulf %128, %131 : vector<32x128xf32>
    %135 = arith.addf %133, %134 : vector<32x128xf32>
    %136 = math.tanh %135 : vector<32x128xf32>
    %137 = arith.mulf %129, %136 : vector<32x128xf32>
    %c0_54 = arith.constant 0 : index
    %c0_55 = arith.constant 0 : index
    %138 = vector.load %arg15[%c0_54, %c0_55] : memref<32x128xf32, #tpu.memory_space<vmem>>, vector<32x128xf32>
    tpu.vector_store %arg15[%c0_54, %c0_55], %137 {strides = array<i32>} : memref<32x128xf32, #tpu.memory_space<vmem>>, vector<32x128xf32>,
    return
  }
  func.func @transform_0(%arg0: i32) -> (i32, i32) {
    %c0_i32 = arith.constant 0 : i32
    %c0_i32_0 = arith.constant 0 : i32
    return %c0_i32, %arg0 : i32, i32
  }
  func.func @transform_1(%arg0: i32) -> (i32, i32) {
    %c0_i32 = arith.constant 0 : i32
    %c0_i32_0 = arith.constant 0 : i32
    %c0_i32_1 = arith.constant 0 : i32
    return %c0_i32, %c0_i32_0 : i32, i32
  }
  func.func @transform_2(%arg0: i32) -> (i32, i32) {
    %c0_i32 = arith.constant 0 : i32
    %c0_i32_0 = arith.constant 0 : i32
    %c0_i32_1 = arith.constant 0 : i32
    return %c0_i32, %c0_i32_0 : i32, i32
  }
  func.func @transform_3(%arg0: i32) -> (i32, i32) {
    %c0_i32 = arith.constant 0 : i32
    %c0_i32_0 = arith.constant 0 : i32
    %c0_i32_1 = arith.constant 0 : i32
    return %c0_i32, %c0_i32_0 : i32, i32
  }
  func.func @transform_4(%arg0: i32) -> (i32, i32) {
    %c0_i32 = arith.constant 0 : i32
    %c0_i32_0 = arith.constant 0 : i32
    %c0_i32_1 = arith.constant 0 : i32
    return %c0_i32, %c0_i32_0 : i32, i32
  }
  func.func @transform_5(%arg0: i32) -> (i32, i32) {
    %c0_i32 = arith.constant 0 : i32
    %c0_i32_0 = arith.constant 0 : i32
    %c0_i32_1 = arith.constant 0 : i32
    return %c0_i32, %c0_i32_0 : i32, i32
  }
  func.func @transform_6(%arg0: i32) -> (i32, i32) {
    %c0_i32 = arith.constant 0 : i32
    %c0_i32_0 = arith.constant 0 : i32
    %c0_i32_1 = arith.constant 0 : i32
    return %c0_i32, %c0_i32_0 : i32, i32
  }
  func.func @transform_7(%arg0: i32) -> (i32, i32) {
    %c0_i32 = arith.constant 0 : i32
    %c0_i32_0 = arith.constant 0 : i32
    %c0_i32_1 = arith.constant 0 : i32
    return %c0_i32, %c0_i32_0 : i32, i32
  }
  func.func @transform_8(%arg0: i32) -> (i32, i32) {
    %c0_i32 = arith.constant 0 : i32
    %c0_i32_0 = arith.constant 0 : i32
    %c0_i32_1 = arith.constant 0 : i32
    return %c0_i32, %c0_i32_0 : i32, i32
  }
  func.func @transform_9(%arg0: i32) -> (i32, i32) {
    %c0_i32 = arith.constant 0 : i32
    %c0_i32_0 = arith.constant 0 : i32
    %c0_i32_1 = arith.constant 0 : i32
    return %c0_i32, %c0_i32_0 : i32, i32
  }
  func.func @transform_10(%arg0: i32) -> (i32, i32) {
    %c0_i32 = arith.constant 0 : i32
    %c0_i32_0 = arith.constant 0 : i32
    %c0_i32_1 = arith.constant 0 : i32
    return %c0_i32, %c0_i32_0 : i32, i32
  }
  func.func @transform_11(%arg0: i32) -> (i32, i32) {
    %c0_i32 = arith.constant 0 : i32
    %c0_i32_0 = arith.constant 0 : i32
    %c0_i32_1 = arith.constant 0 : i32
    return %c0_i32, %c0_i32_0 : i32, i32
  }
  func.func @transform_12(%arg0: i32) -> (i32, i32) {
    %c0_i32 = arith.constant 0 : i32
    %c0_i32_0 = arith.constant 0 : i32
    %c0_i32_1 = arith.constant 0 : i32
    return %c0_i32, %c0_i32_0 : i32, i32
  }
  func.func @transform_13(%arg0: i32) -> (i32, i32) {
    %c0_i32 = arith.constant 0 : i32
    %c0_i32_0 = arith.constant 0 : i32
    %c0_i32_1 = arith.constant 0 : i32
    return %c0_i32, %c0_i32_0 : i32, i32
  }
  func.func @transform_14(%arg0: i32) -> (i32, i32) {
    %c0_i32 = arith.constant 0 : i32
    %c0_i32_0 = arith.constant 0 : i32
    return %c0_i32, %arg0 : i32, i32
  }
}

</mosaic_0001>

<bundles_post_ra>
// kernel: tpu_custom_call.1
= control target key start
LH: loop header
LB: loop body
LE: loop exit
PB: predicated region body
PF: predicated region fallthrough
CT: control target
= control target key end

     0   :  { %v3936_v3 = vmov 0   ;;  %vm659_vm0 = vcmask 261120   ;;  %s4711_s0 = inlined_call_operand.vmem [shape: f32[32,128], index: 0, kind: input, shape index: {}]   ;;  %s4712_s1 = inlined_call_operand.vmem [shape: bf16[512,32], index: 1, kind: input, shape index: {}]   ;;  %s4713_s2 = inlined_call_operand.vmem [shape: f32[512,1], index: 2, kind: input, shape index: {}]   ;;  %s4714_s3 = inlined_call_operand.vmem [shape: bf16[128,32], index: 3, kind: input, shape index: {}]   ;;  %s4715_s4 = inlined_call_operand.vmem [shape: bf16[128,32], index: 4, kind: input, shape index: {}]   ;;  %s4716_s5 = inlined_call_operand.vmem [shape: bf16[128,32], index: 5, kind: input, shape index: {}]   ;;  %s4717_s6 = inlined_call_operand.vmem [shape: bf16[32,32], index: 6, kind: input, shape index: {}]   ;;  %s4718_s7 = inlined_call_operand.vmem [shape: bf16[32,32], index: 7, kind: input, shape index: {}]   ;;  %s4719_s8 = inlined_call_operand.vmem [shape: bf16[32,32], index: 8, kind: input, shape index: {}]   ;;  %s4720_s9 = inlined_call_operand.vmem [shape: bf16[32,32], index: 9, kind: input, shape index: {}]   ;;  %s4721_s10 = inlined_call_operand.vmem [shape: bf16[32,32], index: 10, kind: input, shape index: {}]   ;;  %s4722_s11 = inlined_call_operand.vmem [shape: bf16[32,32], index: 11, kind: input, shape index: {}]   ;;  %s4723_s12 = inlined_call_operand.vmem [shape: bf16[32,32], index: 12, kind: input, shape index: {}]   ;;  %s4724_s13 = inlined_call_operand.vmem [shape: bf16[32,32], index: 13, kind: input, shape index: {}]   ;;  %s4725_s14 = inlined_call_operand.hbm [shape: f32[32,128], index: 14, kind: output, shape index: {}]  }
   0x1   :  { %v121_v0 = vld [vmem:[%s4713_s2 + $0x10] sm:$0xff]  ;;  %v119_v1 = vld [vmem:[%s4713_s2] sm:$0xff]  ;;  %3503 = vset.pattern.permute.xlu1 %v3936_v3  ;;  %3502 = vset.pattern.permute.xlu0 %v3936_v3  ;;  %v50_v4 = vld [vmem:[%s4711_s0 + $0x8] sm:$0xff] }
   0x2   :  { %v49_v2 = vld [vmem:[%s4711_s0] sm:$0xff]  ;;  %195 = vperm.xlu1 %3503, %v121_v0   ;;  %185 = vperm.xlu0 %3502, %v119_v1   ;;  %v122_v6 = vld [vmem:[%s4713_s2 + $0x18] sm:$0xff]  ;;  %v51_v7 = vld [vmem:[%s4711_s0 + $0x10] sm:$0xff] }
   0x3   :  { %v53_v5 = vpack.c.bf16 %v50_v4, %v49_v2  ;;  %v52_v8 = vld [vmem:[%s4711_s0 + $0x18] sm:$0xff]  ;;  %v120_v9 = vld [vmem:[%s4713_s2 + $0x8] sm:$0xff]  ;;  %v3504_v11 = vld [vmem:[%s4712_s1] sm:$0xff]  }
   0x4   :  { %v54_v10 = vpack.c.bf16 %v52_v8, %v51_v7  ;;  %v3505_v12 = vld [vmem:[%s4712_s1 + $0x80] sm:$0xff]   ;;  %v128_v13 = vld [vmem:[%s4713_s2 + $0x48] sm:$0xff]  ;;  %3178 = vmatprep.mubr.msk.bf16.mxu0 %vm659_vm0, %v3504_v11  ;;  %v3508_v18 = vld [vmem:[%s4712_s1 + $0x10] sm:$0xff]  }
   0x5   :  { %3174 = vmatprep.subr.bf16.mxu0 %v53_v5  ;;  %3398 = vmatprep.subr.bf16.mxu1 %v53_v5  ;;  %v127_v14 = vld [vmem:[%s4713_s2 + $0x40] sm:$0xff]  ;;  %v3506_v15 = vld [vmem:[%s4712_s1 + $0x8] sm:$0xff]   ;;  %v3509_v19 = vld [vmem:[%s4712_s1 + $0x90] sm:$0xff]  }
   0x6   :  { %3175 = vmatpush3.bf16.msra.mxu0 %v53_v5  ;;  %3400 = vmatpush3.bf16.msra.mxu1 %v53_v5  ;;  %v3507_v16 = vld [vmem:[%s4712_s1 + $0x88] sm:$0xff]   ;;  %v131_v20 = vld [vmem:[%s4713_s2 + $0x60] sm:$0xff]  ;;  %v130_v21 = vld [vmem:[%s4713_s2 + $0x58] sm:$0xff] }
   0x7   :  { %200 = vperm.xlu1 %3503, %v122_v6   ;;  %190 = vperm.xlu0 %3502, %v120_v9   ;;  %v132_v17 = vld [vmem:[%s4713_s2 + $0x68] sm:$0xff]  ;;  %v129_v22 = vld [vmem:[%s4713_s2 + $0x50] sm:$0xff]  ;;  %v3510_v23 = vld [vmem:[%s4712_s1 + $0x18] sm:$0xff]  }
   0x8   :  { %3176 = vmatprep.subr.bf16.mxu0 %v54_v10  ;;  %3399 = vmatprep.subr.bf16.mxu1 %v54_v10  ;;  %v3511_v24 = vld [vmem:[%s4712_s1 + $0x98] sm:$0xff]   ;;  %v3512_v25 = vld [vmem:[%s4712_s1 + $0x20] sm:$0xff]   ;;  %v133_v28 = vld [vmem:[%s4713_s2 + $0x70] sm:$0xff] }
   0x9   :  { %3210 = vmatprep.mubr.msk.bf16.mxu1 %vm659_vm0, %v3505_v12  ;;  %v3513_v26 = vld [vmem:[%s4712_s1 + $0xa0] sm:$0xff]   ;;  %v134_v27 = vld [vmem:[%s4713_s2 + $0x78] sm:$0xff]  ;;  %v136_v29 = vld [vmem:[%s4713_s2 + $0x88] sm:$0xff] }
   0xa   :  { %3177 = vmatpush3.bf16.msra.mxu0 %v54_v10  ;;  %3401 = vmatpush3.bf16.msra.mxu1 %v54_v10  ;;  %v135_v30 = vld [vmem:[%s4713_s2 + $0x80] sm:$0xff]  ;;  %v3514_v31 = vld [vmem:[%s4712_s1 + $0x28] sm:$0xff]   ;;  %v3516_v33 = vld [vmem:[%s4712_s1 + $0x30] sm:$0xff]  }
   0xb   :  { %226 = vperm.xlu1 %3503, %v128_v13   ;;  %221 = vperm.xlu0 %3502, %v127_v14   ;;  %v3515_v32 = vld [vmem:[%s4712_s1 + $0xa8] sm:$0xff]   ;;  %v3517_v34 = vld [vmem:[%s4712_s1 + $0xb0] sm:$0xff]   ;;  %v139_v36 = vld [vmem:[%s4713_s2 + $0xa0] sm:$0xff] }
   0xc   :  { %v140_v35 = vld [vmem:[%s4713_s2 + $0xa8] sm:$0xff]  ;;  %v138_v37 = vld [vmem:[%s4713_s2 + $0x98] sm:$0xff]  ;;  %v137_v38 = vld [vmem:[%s4713_s2 + $0x90] sm:$0xff] }
   0xd   :  { %3179 = vmatmul.mubr.msk.bf16.vlgmr.msra.gmra.mrb[0].mxu0 %vm659_vm0, %v3506_v15  ;;  %3211 = vmatmul.mubr.msk.bf16.vlgmr.msra.gmra.mrb[0].mxu1 %vm659_vm0, %v3507_v16  ;;  %v3518_v39 = vld [vmem:[%s4712_s1 + $0x38] sm:$0xff]   ;;  %v3520_v41 = vld [vmem:[%s4712_s1 + $0xc0] sm:$0xff]   ;;  %v141_v43 = vld [vmem:[%s4713_s2 + $0xb0] sm:$0xff] }
   0xe   :  { %3182 = vmatprep.mubr.msk.bf16.mxu0 %vm659_vm0, %v3508_v18  ;;  %3214 = vmatprep.mubr.msk.bf16.mxu1 %vm659_vm0, %v3509_v19  ;;  %v3519_v40 = vld [vmem:[%s4712_s1 + $0xb8] sm:$0xff]   ;;  %v144_v44 = vld [vmem:[%s4713_s2 + $0xc8] sm:$0xff]  ;;  %v143_v45 = vld [vmem:[%s4713_s2 + $0xc0] sm:$0xff] }
   0xf   :  { %246 = vperm.xlu1 %3503, %v132_v17   ;;  %241 = vperm.xlu0 %3502, %v131_v20   ;;  %v142_v42 = vld [vmem:[%s4713_s2 + $0xb8] sm:$0xff]  ;;  %v3521_v46 = vld [vmem:[%s4712_s1 + $0xc8] sm:$0xff]   ;;  %v3522_v47 = vld [vmem:[%s4712_s1 + $0xd0] sm:$0xff]  }
  0x10   :  { %v148_v48 = vld [vmem:[%s4713_s2 + $0xe8] sm:$0xff]  ;;  %v147_v49 = vld [vmem:[%s4713_s2 + $0xe0] sm:$0xff]  ;;  %v146_v50 = vld [vmem:[%s4713_s2 + $0xd8] sm:$0xff] }
  0x11   :  { %v145_v51 = vld [vmem:[%s4713_s2 + $0xd0] sm:$0xff]  ;;  %v3523_v52 = vld [vmem:[%s4712_s1 + $0xd8] sm:$0xff]   ;;  %v3524_v53 = vld [vmem:[%s4712_s1 + $0xe0] sm:$0xff]  }
  0x12   :  { %v150_v54 = vld [vmem:[%s4713_s2 + $0xf8] sm:$0xff]  ;;  %v149_v55 = vld [vmem:[%s4713_s2 + $0xf0] sm:$0xff]  ;;  %v152_v56 = vld [vmem:[%s4713_s2 + $0x108] sm:$0xff] }
  0x13   :  { %236 = vperm.xlu1 %3503, %v130_v21   ;;  %231 = vperm.xlu0 %3502, %v129_v22   ;;  %v151_v57 = vld [vmem:[%s4713_s2 + $0x100] sm:$0xff]  ;;  %v3525_v58 = vld [vmem:[%s4712_s1 + $0xe8] sm:$0xff]   ;;  %v3526_v59 = vld [vmem:[%s4712_s1 + $0xf0] sm:$0xff]  }
  0x14   :  { %v156_v60 = vld [vmem:[%s4713_s2 + $0x128] sm:$0xff]  ;;  %v155_v61 = vld [vmem:[%s4713_s2 + $0x120] sm:$0xff]  ;;  %v154_v62 = vld [vmem:[%s4713_s2 + $0x118] sm:$0xff] }
  0x15   :  { %3183 = vmatmul.mubr.msk.bf16.gmra.mrb[4].mxu0 %vm659_vm0, %v3510_v23  ;;  %3215 = vmatmul.mubr.msk.bf16.gmra.mrb[4].mxu1 %vm659_vm0, %v3511_v24  ;;  %v153_v63 = vld [vmem:[%s4713_s2 + $0x110] sm:$0xff]  ;;  %v3527_v0 = vld [vmem:[%s4712_s1 + $0xf8] sm:$0xff]   ;;  %v160_v3 = vld [vmem:[%s4713_s2 + $0x148] sm:$0xff] }
  0x16   :  { %3186 = vmatprep.mubr.msk.bf16.mxu0 %vm659_vm0, %v3512_v25  ;;  %3218 = vmatprep.mubr.msk.bf16.mxu1 %vm659_vm0, %v3513_v26  ;;  %v158_v1 = vld [vmem:[%s4713_s2 + $0x138] sm:$0xff]  ;;  %v157_v2 = vld [vmem:[%s4713_s2 + $0x130] sm:$0xff]  ;;  %v159_v4 = vld [vmem:[%s4713_s2 + $0x140] sm:$0xff] }
  0x17   :  { %256 = vperm.xlu1 %3503, %v134_v27   ;;  %251 = vperm.xlu0 %3502, %v133_v28   ;;  %v164_v5 = vld [vmem:[%s4713_s2 + $0x168] sm:$0xff]  ;;  %v163_v6 = vld [vmem:[%s4713_s2 + $0x160] sm:$0xff] }
  0x1b   :  { %266 = vperm.xlu1 %3503, %v136_v29   ;;  %261 = vperm.xlu0 %3502, %v135_v30  }
  0x1d   :  { %3187 = vmatmul.mubr.msk.bf16.gmra.mrb[8].mxu0 %vm659_vm0, %v3514_v31  ;;  %3219 = vmatmul.mubr.msk.bf16.gmra.mrb[8].mxu1 %vm659_vm0, %v3515_v32 }
  0x1e   :  { %3190 = vmatprep.mubr.msk.bf16.mxu0 %vm659_vm0, %v3516_v33  ;;  %3222 = vmatprep.mubr.msk.bf16.mxu1 %vm659_vm0, %v3517_v34 }
  0x1f   :  { %286 = vperm.xlu1 %3503, %v140_v35   ;;  %281 = vperm.xlu0 %3502, %v139_v36  }
  0x23   :  { %276 = vperm.xlu1 %3503, %v138_v37   ;;  %271 = vperm.xlu0 %3502, %v137_v38  }
  0x25   :  { %3191 = vmatmul.mubr.msk.bf16.gmra.mrb[12].mxu0 %vm659_vm0, %v3518_v39  ;;  %3223 = vmatmul.mubr.msk.bf16.gmra.mrb[12].mxu1 %vm659_vm0, %v3519_v40 }
  0x26   :  { %3226 = vmatprep.mubr.msk.bf16.mxu1 %vm659_vm0, %v3520_v41 }
  0x27   :  { %296 = vperm.xlu1 %3503, %v142_v42   ;;  %291 = vperm.xlu0 %3502, %v141_v43  }
  0x2b   :  { %306 = vperm.xlu1 %3503, %v144_v44   ;;  %301 = vperm.xlu0 %3502, %v143_v45  }
  0x2d   :  { %3227 = vmatmul.mubr.msk.bf16.gmra.mrb[16].mxu1 %vm659_vm0, %v3521_v46 }
  0x2e   :  { %3230 = vmatprep.mubr.msk.bf16.mxu1 %vm659_vm0, %v3522_v47 }
  0x2f   :  { %326 = vperm.xlu1 %3503, %v148_v48   ;;  %321 = vperm.xlu0 %3502, %v147_v49  }
  0x33   :  { %316 = vperm.xlu1 %3503, %v146_v50   ;;  %311 = vperm.xlu0 %3502, %v145_v51  }
  0x35   :  { %3231 = vmatmul.mubr.msk.bf16.gmra.mrb[20].mxu1 %vm659_vm0, %v3523_v52 }
  0x36   :  { %3234 = vmatprep.mubr.msk.bf16.mxu1 %vm659_vm0, %v3524_v53 }
  0x37   :  { %336 = vperm.xlu1 %3503, %v150_v54   ;;  %331 = vperm.xlu0 %3502, %v149_v55  }
  0x3b   :  { %346 = vperm.xlu1 %3503, %v152_v56   ;;  %341 = vperm.xlu0 %3502, %v151_v57  }
  0x3d   :  { %3235 = vmatmul.mubr.msk.bf16.gmra.mrb[24].mxu1 %vm659_vm0, %v3525_v58 }
  0x3e   :  { %3238 = vmatprep.mubr.msk.bf16.mxu1 %vm659_vm0, %v3526_v59 }
  0x3f   :  { %366 = vperm.xlu1 %3503, %v156_v60   ;;  %361 = vperm.xlu0 %3502, %v155_v61  }
  0x43   :  { %356 = vperm.xlu1 %3503, %v154_v62   ;;  %351 = vperm.xlu0 %3502, %v153_v63  }
  0x45   :  { %3239 = vmatmul.mubr.msk.bf16.gmra.mrb[28].mxu1 %vm659_vm0, %v3527_v0 }
  0x47   :  { %376 = vperm.xlu1 %3503, %v158_v1   ;;  %371 = vperm.xlu0 %3502, %v157_v2  }
  0x4b   :  { %386 = vperm.xlu1 %3503, %v160_v3   ;;  %381 = vperm.xlu0 %3502, %v159_v4  }
  0x4c   :  { %19 = vsyncpa [#allocation3], 0  ;;  %v162_v7 = vld [vmem:[%s4713_s2 + $0x158] sm:$0xff]  ;;  %v161_v8 = vld [vmem:[%s4713_s2 + $0x150] sm:$0xff] }
  0x4d   :  { %v166_v9 = vld [vmem:[%s4713_s2 + $0x178] sm:$0xff]  ;;  %v165_v10 = vld [vmem:[%s4713_s2 + $0x170] sm:$0xff]  ;;  %v168_v11 = vld [vmem:[%s4713_s2 + $0x188] sm:$0xff] }
  0x4e   :  { %v167_v12 = vld [vmem:[%s4713_s2 + $0x180] sm:$0xff]  ;;  %v170_v13 = vld [vmem:[%s4713_s2 + $0x198] sm:$0xff]  ;;  %v169_v14 = vld [vmem:[%s4713_s2 + $0x190] sm:$0xff] }
  0x4f   :  { %406 = vperm.xlu1 %3503, %v164_v5   ;;  %401 = vperm.xlu0 %3502, %v163_v6   ;;  %v172_v15 = vld [vmem:[%s4713_s2 + $0x1a8] sm:$0xff]  ;;  %v171_v16 = vld [vmem:[%s4713_s2 + $0x1a0] sm:$0xff]  ;;  %v174_v17 = vld [vmem:[%s4713_s2 + $0x1b8] sm:$0xff] }
  0x50   :  { %v173_v18 = vld [vmem:[%s4713_s2 + $0x1b0] sm:$0xff]  ;;  %v176_v19 = vld [vmem:[%s4713_s2 + $0x1c8] sm:$0xff]  ;;  %v175_v20 = vld [vmem:[%s4713_s2 + $0x1c0] sm:$0xff] }
  0x51   :  { %v178_v21 = vld [vmem:[%s4713_s2 + $0x1d8] sm:$0xff]  ;;  %v177_v22 = vld [vmem:[%s4713_s2 + $0x1d0] sm:$0xff]  ;;  %v180_v23 = vld [vmem:[%s4713_s2 + $0x1e8] sm:$0xff] }
  0x52   :  { %v179_v24 = vld [vmem:[%s4713_s2 + $0x1e0] sm:$0xff]  ;;  %v182_v25 = vld [vmem:[%s4713_s2 + $0x1f8] sm:$0xff]  ;;  %v181_v26 = vld [vmem:[%s4713_s2 + $0x1f0] sm:$0xff] }
  0x53   :  { %396 = vperm.xlu1 %3503, %v162_v7   ;;  %391 = vperm.xlu0 %3502, %v161_v8   ;;  %v3528_v27 = vld [vmem:[%s4717_s6] sm:$0xff]  }
  0x54   :  { %3246 = vmatprep.mubr.msk.bf16.mxu1 %vm659_vm0, %v3528_v27 }
  0x57   :  { %416 = vperm.xlu1 %3503, %v166_v9   ;;  %411 = vperm.xlu0 %3502, %v165_v10  }
  0x5b   :  { %426 = vperm.xlu1 %3503, %v168_v11   ;;  %421 = vperm.xlu0 %3502, %v167_v12  }
  0x5f   :  { %436 = vperm.xlu1 %3503, %v170_v13   ;;  %431 = vperm.xlu0 %3502, %v169_v14  }
  0x63   :  { %446 = vperm.xlu1 %3503, %v172_v15   ;;  %441 = vperm.xlu0 %3502, %v171_v16  }
  0x67   :  { %456 = vperm.xlu1 %3503, %v174_v17   ;;  %451 = vperm.xlu0 %3502, %v173_v18  }
  0x6b   :  { %466 = vperm.xlu1 %3503, %v176_v19   ;;  %461 = vperm.xlu0 %3502, %v175_v20  }
  0x6f   :  { %476 = vperm.xlu1 %3503, %v178_v21   ;;  %471 = vperm.xlu0 %3502, %v177_v22  }
  0x73   :  { %486 = vperm.xlu1 %3503, %v180_v23   ;;  %481 = vperm.xlu0 %3502, %v179_v24  }
  0x77   :  { %496 = vperm.xlu1 %3503, %v182_v25   ;;  %491 = vperm.xlu0 %3502, %v181_v26  }
  0x81   :  { %v196_v28 = vpop.permute.xlu1 %195  ;;  %v186_v29 = vpop.permute.xlu0 %185 }
  0x86   :  { %v201_v30 = vpop.permute.xlu1 %200  ;;  %v191_v31 = vpop.permute.xlu0 %190 }
  0x8a   :  { %v227_v32 = vpop.permute.xlu1 %226  ;;  %v222_v33 = vpop.permute.xlu0 %221 }
  0x8e   :  { %v247_v50 = vpop.permute.xlu1 %246  ;;  %v242_v51 = vpop.permute.xlu0 %241 }
  0x92   :  { %v237_v61 = vpop.permute.xlu1 %236  ;;  %v232_v62 = vpop.permute.xlu0 %231 }
  0x96   :  { %v257_v21 = vpop.permute.xlu1 %256  ;;  %v252_v22 = vpop.permute.xlu0 %251 }
  0xe0   :  { %v3180_v34 = vpop.f32.mrb[0].mxu0  ;;  %v4307_v35 = vpop.f32.mrb[0].mxu1 }
  0xe1   :  { %v799_v36 = vadd.f32 %v3180_v34, %v196_v28  ;;  %v790_v37 = vpop.f32.mrb[1].mxu0  ;;  %v4309_v38 = vpop.f32.mrb[1].mxu1 }
  0xe2   :  { %v791_v39 = vadd.f32 %v790_v37, %v186_v29  ;;  %v3181_v40 = vpop.f32.mrb[2].mxu0  ;;  %v4311_v46 = vpop.f32.mrb[2].mxu1 }
  0xe3   :  { %v2932_v41 = vmul.f32 -1.442695, %v799_v36  ;;  %v802_v42 = vadd.f32 %v3181_v40, %v201_v30  ;;  %v793_v43 = vpop.f32.mrb[3].mxu0  ;;  %v4313_v48 = vpop.f32.mrb[3].mxu1 }
  0xe4   :  { %v2930_v44 = vmul.f32 -1.442695, %v791_v39  ;;  %v794_v45 = vadd.f32 %v793_v43, %v191_v31 }
  0xe5   :  { %3576 = vpow2.f32 %v2932_v41  ;;  %v2933_v47 = vmul.f32 -1.442695, %v802_v42 }
  0xe6   :  { %3578 = vpow2.f32 %v2930_v44  ;;  %v2931_v49 = vmul.f32 -1.442695, %v794_v45 }
  0xe7   :  { %3580 = vpow2.f32 %v2933_v47 }
  0xe8   :  { %v3184_v52 = vpop.f32.mrb[4].mxu0  ;;  %v4315_v53 = vpop.f32.mrb[4].mxu1  ;;  %3582 = vpow2.f32 %v2931_v49 }
  0xe9   :  { %v806_v54 = vpop.f32.mrb[5].mxu0  ;;  %v4317_v55 = vpop.f32.mrb[5].mxu1 }
  0xea   :  { %v3185_v56 = vpop.f32.mrb[6].mxu0  ;;  %v4319_v57 = vpop.f32.mrb[6].mxu1 }
  0xeb   :  { %v808_v58 = vpop.f32.mrb[7].mxu0  ;;  %v4321_v59 = vpop.f32.mrb[7].mxu1 }
  0xef   :  { %v3577_v60 = vpop.eup %3576 }
  0xf0   :  { %v3579_v63 = vpop.eup %3578  ;;  %v1067_v0 = vadd.f32 1.0, %v3577_v60  ;;  %v3188_v1 = vpop.f32.mrb[8].mxu0 }
  0xf1   :  { %v4323_v2 = vpop.f32.mrb[8].mxu1  ;;  %v3581_v3 = vpop.eup %3580  ;;  %v1065_v4 = vadd.f32 1.0, %v3579_v63  ;;  %v827_v5 = vadd.f32 %v3188_v1, %v232_v62 }
  0xf2   :  { %v818_v6 = vpop.f32.mrb[9].mxu0  ;;  %v4325_v7 = vpop.f32.mrb[9].mxu1  ;;  %v1068_v8 = vadd.f32 1.0, %v3581_v3  ;;  %3584 = vrcp.f32 %v1067_v0 }
  0xf3   :  { %v819_v9 = vadd.f32 %v818_v6, %v222_v33  ;;  %v3189_v10 = vpop.f32.mrb[10].mxu0  ;;  %v4327_v11 = vpop.f32.mrb[10].mxu1  ;;  %v2936_v13 = vmul.f32 -1.442695, %v827_v5  ;;  %3586 = vrcp.f32 %v1065_v4 }
  0xf4   :  { %v3583_v12 = vpop.eup %3582  ;;  %v830_v14 = vadd.f32 %v3189_v10, %v237_v61  ;;  %v821_v16 = vpop.f32.mrb[11].mxu0  ;;  %3588 = vrcp.f32 %v1068_v8 }
  0xf5   :  { %v2934_v15 = vmul.f32 -1.442695, %v819_v9  ;;  %v4329_v17 = vpop.f32.mrb[11].mxu1  ;;  %v822_v19 = vadd.f32 %v821_v16, %v227_v32  ;;  %v1066_v20 = vadd.f32 1.0, %v3583_v12  ;;  %3590 = vpow2.f32 %v2936_v13 }
  0xf6   :  { %v2937_v18 = vmul.f32 -1.442695, %v830_v14 }
  0xf7   :  { %3592 = vpow2.f32 %v2934_v15  ;;  %v2935_v23 = vmul.f32 -1.442695, %v822_v19 }
  0xf8   :  { %3594 = vpow2.f32 %v2937_v18  ;;  %v3192_v24 = vpop.f32.mrb[12].mxu0  ;;  %v4331_v25 = vpop.f32.mrb[12].mxu1 }
  0xf9   :  { %3596 = vpow2.f32 %v2935_v23  ;;  %v843_v26 = vadd.f32 %v3192_v24, %v252_v22  ;;  %v834_v27 = vpop.f32.mrb[13].mxu0  ;;  %v4333_v28 = vpop.f32.mrb[13].mxu1 }
  0xfa   :  { %3598 = vrcp.f32 %v1066_v20  ;;  %v835_v29 = vadd.f32 %v834_v27, %v242_v51  ;;  %v3193_v30 = vpop.f32.mrb[14].mxu0  ;;  %v4335_v31 = vpop.f32.mrb[14].mxu1 }
  0xfb   :  { %3600 = vtanh.f32 %v843_v26  ;;  %v846_v32 = vadd.f32 %v3193_v30, %v257_v21  ;;  %v837_v33 = vpop.f32.mrb[15].mxu0  ;;  %v4337_v34 = vpop.f32.mrb[15].mxu1 }
  0xfc   :  { %3602 = vtanh.f32 %v835_v29  ;;  %v838_v36 = vadd.f32 %v837_v33, %v247_v50  ;;  %v3585_v37 = vpop.eup %3584 }
  0xfd   :  { %3604 = vtanh.f32 %v846_v32  ;;  %v3587_v39 = vpop.eup %3586 }
  0xfe   :  { %3606 = vtanh.f32 %v838_v36  ;;  %v3589_v40 = vpop.eup %3588 }
  0xff   :  { %v3591_v41 = vpop.eup %3590 }
 0x100   :  { %v4339_v42 = vpop.f32.mrb[16].mxu1  ;;  %v1071_v44 = vadd.f32 1.0, %v3591_v41 }
 0x101   :  { %v3593_v43 = vpop.eup %3592  ;;  %v4341_v45 = vpop.f32.mrb[17].mxu1 }
 0x102   :  { %v3595_v47 = vpop.eup %3594  ;;  %v1069_v49 = vadd.f32 1.0, %v3593_v43  ;;  %v4343_v51 = vpop.f32.mrb[18].mxu1  ;;  %3608 = vrcp.f32 %v1071_v44  ;;  %v3529_v43 = vld [vmem:[%s4717_s6 + $0x8] sm:$0xff]   ;;  %v3530_v44 = vld [vmem:[%s4718_s7] sm:$0xff]  }
 0x103   :  { %v3597_v52 = vpop.eup %3596  ;;  %v1072_v54 = vadd.f32 1.0, %v3595_v47  ;;  %v4345_v56 = vpop.f32.mrb[19].mxu1  ;;  %v3531_v47 = vld [vmem:[%s4718_s7 + $0x8] sm:$0xff]  }
 0x104   :  { %v3599_v50 = vpop.eup %3598  ;;  %v1070_v58 = vadd.f32 1.0, %v3597_v52  ;;  %3610 = vrcp.f32 %v1069_v49  ;;  %v3532_v49 = vld [vmem:[%s4722_s11] sm:$0xff]  }
 0x105   :  { %v3601_v60 = vpop.eup %3600  ;;  %3612 = vrcp.f32 %v1072_v54  ;;  %v3534_v52 = vld [vmem:[%s4712_s1 + $0x40] sm:$0xff]   ;;  %v3535_v54 = vld [vmem:[%s4712_s1 + $0x48] sm:$0xff]  }
 0x106   :  { %v3603_v61 = vpop.eup %3602  ;;  %v1095_v62 = vmul.f32 %v3601_v60, %v3585_v37  ;;  %3614 = vrcp.f32 %v1070_v58  ;;  %3194 = vmatprep.mubr.msk.bf16.mxu0 %vm659_vm0, %v3534_v52  ;;  %v3536_v52 = vld [vmem:[%s4712_s1 + $0x50] sm:$0xff]  }
 0x107   :  { %v3605_v63 = vpop.eup %3604  ;;  %v1093_v0 = vmul.f32 %v3603_v61, %v3587_v39  ;;  %3195 = vmatmul.mubr.msk.bf16.gmra.mrb[16].mxu0 %vm659_vm0, %v3535_v54  ;;  %v3537_v54 = vld [vmem:[%s4712_s1 + $0x58] sm:$0xff]  }
 0x108   :  { %v3607_v1 = vpop.eup %3606  ;;  %3616 = vtanh.f32 %v1095_v62  ;;  %v1096_v3 = vmul.f32 %v3605_v63, %v3589_v40  ;;  %v4347_v4 = vpop.f32.mrb[20].mxu1  ;;  %3198 = vmatprep.mubr.msk.bf16.mxu0 %vm659_vm0, %v3536_v52 }
 0x109   :  { %3618 = vtanh.f32 %v1093_v0  ;;  %v1094_v5 = vmul.f32 %v3607_v1, %v3599_v50  ;;  %v4349_v6 = vpop.f32.mrb[21].mxu1 }
 0x10a   :  { %3620 = vtanh.f32 %v1096_v3  ;;  %v4351_v8 = vpop.f32.mrb[22].mxu1  ;;  %v1181_v9 = vpack.c.bf16 %v1096_v3, %v1095_v62 }
 0x10b   :  { %3622 = vtanh.f32 %v1094_v5  ;;  %v4353_v10 = vpop.f32.mrb[23].mxu1  ;;  %v1180_v12 = vpack.c.bf16 %v1094_v5, %v1093_v0 }
 0x10c   :  { %v3609_v13 = vpop.eup %3608 }
 0x10e   :  { %v3611_v14 = vpop.eup %3610 }
 0x10f   :  { %v3613_v15 = vpop.eup %3612  ;;  %3199 = vmatmul.mubr.msk.bf16.gmra.mrb[20].mxu0 %vm659_vm0, %v3537_v54  ;;  %v3543_v54 = vld [vmem:[%s4714_s3 + $0x8] sm:$0xff]  }
 0x110   :  { %v4355_v16 = vpop.f32.mrb[24].mxu1  ;;  %v3615_v18 = vpop.eup %3614 }
 0x111   :  { %v4357_v19 = vpop.f32.mrb[25].mxu1 }
 0x112   :  { %v3617_v20 = vpop.eup %3616  ;;  %v4359_v21 = vpop.f32.mrb[26].mxu1 }
 0x113   :  { %v3619_v22 = vpop.eup %3618  ;;  %v4361_v23 = vpop.f32.mrb[27].mxu1  ;;  %v1103_v24 = vmul.f32 %v3617_v20, %v3609_v13 }
 0x114   :  { %v3621_v26 = vpop.eup %3620  ;;  %v1101_v27 = vmul.f32 %v3619_v22, %v3611_v14 }
 0x115   :  { %v3623_v29 = vpop.eup %3622  ;;  %v1104_v30 = vmul.f32 %v3621_v26, %v3613_v15 }
 0x116   :  { %v1102_v32 = vmul.f32 %v3623_v29, %v3615_v18 }
 0x117   :  { %v1110_v33 = vpack.c.bf16 %v1104_v30, %v1103_v24 }
 0x118   :  { %v4363_v36 = vpop.f32.mrb[28].mxu1  ;;  %v1109_v37 = vpack.c.bf16 %v1102_v32, %v1101_v27 }
 0x119   :  { %v4365_v39 = vpop.f32.mrb[29].mxu1 }
 0x11a   :  { %v4367_v40 = vpop.f32.mrb[30].mxu1  ;;  %3242 = vmatprep.subr.bf16.mxu1 %v1109_v37 }
 0x11b   :  { %v4369_v41 = vpop.f32.mrb[31].mxu1  ;;  %3243 = vmatpush3.bf16.msra.mxu1 %v1109_v37  ;;  %v3533_v37 = vld [vmem:[%s4722_s11 + $0x8] sm:$0xff]  }
 0x11c   :  { %4726 = vst [vmem:[#allocation5_spill] sm:$0xff] %v4369_v41  ;;  %3244 = vmatprep.subr.bf16.mxu1 %v1110_v33 }
 0x11f   :  { %3245 = vmatpush3.bf16.msra.mxu1 %v1110_v33 }
 0x120   :  { %3250 = vmatprep.subr.bf16.mxu1 %v1180_v12 }
 0x122   :  { %3247 = vmatmul.mubr.msk.bf16.vlgmr.msra.gmra.mrb[32].mxu1 %vm659_vm0, %v3529_v43 }
 0x123   :  { %3251 = vmatpush3.bf16.msra.mxu1 %v1180_v12  ;;  %3254 = vmatprep.mubr.msk.bf16.mxu1 %vm659_vm0, %v3530_v44 }
 0x124   :  { %3252 = vmatprep.subr.bf16.mxu1 %v1181_v9 }
 0x127   :  { %3253 = vmatpush3.bf16.msra.mxu1 %v1181_v9 }
 0x12a   :  { %3255 = vmatmul.mubr.msk.bf16.vlgmr.msra.gmra.mrb[36].mxu1 %vm659_vm0, %v3531_v47 }
 0x12b   :  { %3262 = vmatprep.mubr.msk.bf16.mxu1 %vm659_vm0, %v3532_v49 }
 0x1f5   :  { %v3248_v50 = vpop.f32.mrb[32].mxu1 }
 0x1f6   :  { %v1161_v58 = vpop.f32.mrb[33].mxu1  ;;  %v1251_v0 = vmul.f32 1.442695, %v3248_v50  ;;  %v3539_v50 = vld [vmem:[%s4712_s1 + $0x68] sm:$0xff]  }
 0x1f7   :  { %v1247_v60 = vmul.f32 1.442695, %v1161_v58  ;;  %v3249_v61 = vpop.f32.mrb[34].mxu1  ;;  %v3540_v58 = vld [vmem:[%s4712_s1 + $0x70] sm:$0xff]  }
 0x1f8   :  { %v1253_v62 = vmul.f32 1.442695, %v3249_v61  ;;  %v1164_v63 = vpop.f32.mrb[35].mxu1  ;;  %v3542_v61 = vld [vmem:[%s4714_s3] sm:$0xff]  }
 0x1f9   :  { %3624 = vpow2.f32 %v1247_v60  ;;  %v1249_v1 = vmul.f32 1.442695, %v1164_v63  ;;  %v3541_v60 = vld [vmem:[%s4712_s1 + $0x78] sm:$0xff]  }
 0x1fa   :  { %3626 = vpow2.f32 %v1253_v62 }
 0x1fb   :  { %3628 = vpow2.f32 %v1249_v1 }
 0x1fc   :  { %3630 = vpow2.f32 %v1251_v0 }
 0x1fd   :  { %v3256_v3 = vpop.f32.mrb[36].mxu1 }
 0x1fe   :  { %v1259_v5 = vmul.f32 1.442695, %v3256_v3  ;;  %v1232_v9 = vpop.f32.mrb[37].mxu1 }
 0x1ff   :  { %v1255_v12 = vmul.f32 1.442695, %v1232_v9  ;;  %v3257_v13 = vpop.f32.mrb[38].mxu1 }
 0x200   :  { %3632 = vpow2.f32 %v1259_v5  ;;  %v1261_v14 = vmul.f32 1.442695, %v3257_v13  ;;  %v1235_v15 = vpop.f32.mrb[39].mxu1 }
 0x201   :  { %3634 = vpow2.f32 %v1255_v12  ;;  %v1257_v18 = vmul.f32 1.442695, %v1235_v15 }
 0x202   :  { %3636 = vpow2.f32 %v1261_v14 }
 0x203   :  { %v3625_v20 = vpop.eup %3624  ;;  %3638 = vpow2.f32 %v1257_v18 }
 0x204   :  { %v3627_v22 = vpop.eup %3626 }
 0x205   :  { %v3629_v24 = vpop.eup %3628 }
 0x206   :  { %v1267_v26 = vpack.c.bf16 %v3629_v24, %v3625_v20  ;;  %v3631_v27 = vpop.eup %3630 }
 0x207   :  { %v1268_v29 = vpack.c.bf16 %v3627_v22, %v3631_v27 }
 0x208   :  { %3258 = vmatprep.subr.bf16.mxu1 %v1267_v26 }
 0x209   :  { %3259 = vmatpush3.bf16.msra.mxu1 %v1267_v26 }
 0x20a   :  { %v4395_v30 = vpop.eup %3632  ;;  %3260 = vmatprep.subr.bf16.mxu1 %v1268_v29 }
 0x20b   :  { %v4397_v32 = vpop.eup %3634 }
 0x20c   :  { %v4399_v33 = vpop.eup %3636 }
 0x20d   :  { %v4404_v43 = vpop.eup %3638  ;;  %3261 = vmatpush3.bf16.msra.mxu1 %v1268_v29  ;;  %v1335_v47 = vpack.c.bf16 %v4399_v33, %v4395_v30 }
 0x20e   :  { %v1334_v44 = vpack.c.bf16 %v4404_v43, %v4397_v32 }
 0x210   :  { %3263 = vmatmul.mubr.msk.bf16.vlgmr.msra.gmra.mrb[40].mxu1 %vm659_vm0, %v3533_v37  ;;  %3266 = vmatprep.subr.bf16.mxu1 %v1334_v44 }
 0x211   :  { %3267 = vmatpush3.bf16.msra.mxu1 %v1334_v44  ;;  %3270 = vmatprep.mubr.msk.bf16.mxu1 %vm659_vm0, %v3532_v49  ;;  %v3538_v49 = vld [vmem:[%s4712_s1 + $0x60] sm:$0xff]  }
 0x212   :  { %3268 = vmatprep.subr.bf16.mxu1 %v1335_v47  ;;  %3202 = vmatprep.mubr.msk.bf16.mxu0 %vm659_vm0, %v3538_v49  ;;  %v3544_v49 = vld [vmem:[%s4714_s3 + $0x10] sm:$0xff]  }
 0x213   :  { %3203 = vmatmul.mubr.msk.bf16.gmra.mrb[24].mxu0 %vm659_vm0, %v3539_v50  ;;  %v3549_v50 = vld [vmem:[%s4714_s3 + $0x38] sm:$0xff]  }
 0x214   :  { %3206 = vmatprep.mubr.msk.bf16.mxu0 %vm659_vm0, %v3540_v58  ;;  %v3550_v58 = vld [vmem:[%s4719_s8] sm:$0xff]  }
 0x215   :  { %3269 = vmatpush3.bf16.msra.mxu1 %v1335_v47 }
 0x218   :  { %3271 = vmatmul.mubr.msk.bf16.vlgmr.msra.gmra.mrb[44].mxu1 %vm659_vm0, %v3533_v37 }
 0x219   :  { %3298 = vmatprep.mubr.msk.bf16.mxu1 %vm659_vm0, %v3550_v58 }
 0x21b   :  { %3207 = vmatmul.mubr.msk.bf16.gmra.mrb[28].mxu0 %vm659_vm0, %v3541_v60  ;;  %v262_v60 = vpop.permute.xlu0 %261 }
 0x21c   :  { %3278 = vmatprep.mubr.msk.bf16.mxu0 %vm659_vm0, %v3542_v61  ;;  %v267_v61 = vpop.permute.xlu1 %266 }
 0x2e3   :  { %v3264_v62 = vpop.f32.mrb[40].mxu1 }
 0x2e4   :  { %3640 = vrcp.f32 %v3264_v62  ;;  %v1319_v63 = vpop.f32.mrb[41].mxu1  ;;  %v282_v62 = vpop.permute.xlu0 %281 }
 0x2e5   :  { %3642 = vrcp.f32 %v1319_v63  ;;  %v3265_v0 = vpop.f32.mrb[42].mxu1  ;;  %v287_v63 = vpop.permute.xlu1 %286 }
 0x2e6   :  { %3644 = vrcp.f32 %v3265_v0  ;;  %v1322_v1 = vpop.f32.mrb[43].mxu1 }
 0x2e7   :  { %3646 = vrcp.f32 %v1322_v1 }
 0x2e8   :  { %v272_v0 = vpop.permute.xlu0 %271 }
 0x2e9   :  { %v277_v1 = vpop.permute.xlu1 %276 }
 0x2eb   :  { %v4441_v3 = vpop.f32.mrb[44].mxu1 }
 0x2ec   :  { %v4443_v5 = vpop.f32.mrb[45].mxu1 }
 0x2ed   :  { %v4445_v9 = vpop.f32.mrb[46].mxu1 }
 0x2ee   :  { %v3641_v12 = vpop.eup %3640  ;;  %v4447_v13 = vpop.f32.mrb[47].mxu1 }
 0x2ef   :  { %v3643_v14 = vpop.eup %3642  ;;  %v1391_v26 = vmul.f32 %v3641_v12, %v3631_v27  ;;  %v3548_v27 = vld [vmem:[%s4714_s3 + $0x30] sm:$0xff]   ;;  %v292_v12 = vpop.permute.xlu0 %291 }
 0x2f0   :  { %v3645_v15 = vpop.eup %3644  ;;  %v1389_v37 = vmul.f32 %v3643_v14, %v3625_v20  ;;  %v3545_v20 = vld [vmem:[%s4714_s3 + $0x18] sm:$0xff]   ;;  %v297_v14 = vpop.permute.xlu1 %296 }
 0x2f1   :  { %v3647_v18 = vpop.eup %3646  ;;  %v1392_v29 = vmul.f32 %v3645_v15, %v3627_v22  ;;  %v3546_v22 = vld [vmem:[%s4714_s3 + $0x20] sm:$0xff]  }
 0x2f2   :  { %v1390_v44 = vmul.f32 %v3647_v18, %v3629_v24  ;;  %v3547_v24 = vld [vmem:[%s4714_s3 + $0x28] sm:$0xff]  }
 0x2f3   :  { %v1418_v47 = vpack.c.bf16 %v1392_v29, %v1391_v26 }
 0x2f4   :  { %v1417_v52 = vpack.c.bf16 %v1390_v44, %v1389_v37 }
 0x2f6   :  { %3274 = vmatprep.subr.bf16.mxu0 %v1417_v52 }
 0x2f7   :  { %3275 = vmatpush3.bf16.msra.mxu0 %v1417_v52 }
 0x2f8   :  { %3276 = vmatprep.subr.bf16.mxu0 %v1418_v47 }
 0x2fb   :  { %3277 = vmatpush3.bf16.msra.mxu0 %v1418_v47 }
 0x2fe   :  { %3279 = vmatmul.mubr.msk.bf16.vlgmr.msra.gmra.mrb[16].mxu0 %vm659_vm0, %v3543_v54  ;;  %v302_v54 = vpop.permute.xlu0 %301 }
 0x2ff   :  { %3282 = vmatprep.mubr.msk.bf16.mxu0 %vm659_vm0, %v3544_v49 }
 0x306   :  { %3283 = vmatmul.mubr.msk.bf16.gmra.mrb[20].mxu0 %vm659_vm0, %v3545_v20 }
 0x307   :  { %3286 = vmatprep.mubr.msk.bf16.mxu0 %vm659_vm0, %v3546_v22 }
 0x30e   :  { %3287 = vmatmul.mubr.msk.bf16.gmra.mrb[24].mxu0 %vm659_vm0, %v3547_v24  ;;  %v307_v24 = vpop.permute.xlu1 %306 }
 0x30f   :  { %3290 = vmatprep.mubr.msk.bf16.mxu0 %vm659_vm0, %v3548_v27 }
 0x316   :  { %3291 = vmatmul.mubr.msk.bf16.gmra.mrb[28].mxu0 %vm659_vm0, %v3549_v50 }
 0x3d1   :  { %v3280_v15 = vpop.f32.mrb[16].mxu0 }
 0x3d2   :  { %v3402_v18 = vadd.f32 %v3280_v15, %v272_v0  ;;  %v1517_v26 = vpop.f32.mrb[17].mxu0  ;;  %v4481_v0 = vpop.permute.xlu0 %321 }
 0x3d3   :  { %v3403_v29 = vadd.f32 %v1517_v26, %v262_v60  ;;  %v3281_v37 = vpop.f32.mrb[18].mxu0  ;;  %v4485_v26 = vpop.permute.xlu1 %326 }
 0x3d4   :  { %v2970_v44 = vmul.f32 -1.442695, %v3402_v18  ;;  %v3404_v47 = vadd.f32 %v3281_v37, %v277_v1  ;;  %v1520_v52 = vpop.f32.mrb[19].mxu0 }
 0x3d5   :  { %v2968_v49 = vmul.f32 -1.442695, %v3403_v29  ;;  %v3405_v20 = vadd.f32 %v1520_v52, %v267_v61 }
 0x3d6   :  { %3648 = vpow2.f32 %v2970_v44  ;;  %v2971_v22 = vmul.f32 -1.442695, %v3404_v47 }
 0x3d7   :  { %3650 = vpow2.f32 %v2968_v49  ;;  %v2969_v27 = vmul.f32 -1.442695, %v3405_v20 }
 0x3d8   :  { %3652 = vpow2.f32 %v2971_v22  ;;  %v317_v22 = vpop.permute.xlu1 %316 }
 0x3d9   :  { %3654 = vpow2.f32 %v2969_v27  ;;  %v3284_v50 = vpop.f32.mrb[20].mxu0 }
 0x3da   :  { %v3406_v58 = vadd.f32 %v3284_v50, %v292_v12  ;;  %v1533_v41 = vpop.f32.mrb[21].mxu0  ;;  %3656 = vrcp.f32 %v4441_v3 }
 0x3db   :  { %v3407_v60 = vadd.f32 %v1533_v41, %v282_v62  ;;  %v3285_v1 = vpop.f32.mrb[22].mxu0  ;;  %3658 = vrcp.f32 %v4443_v5  ;;  %v312_v41 = vpop.permute.xlu0 %311 }
 0x3dc   :  { %v2974_v15 = vmul.f32 -1.442695, %v3406_v58  ;;  %v3408_v61 = vadd.f32 %v3285_v1, %v297_v14  ;;  %v1536_v18 = vpop.f32.mrb[23].mxu0  ;;  %3660 = vrcp.f32 %v4445_v9 }
 0x3dd   :  { %v2972_v29 = vmul.f32 -1.442695, %v3407_v60  ;;  %v3409_v37 = vadd.f32 %v1536_v18, %v287_v63 }
 0x3de   :  { %3662 = vpow2.f32 %v2974_v15  ;;  %v2975_v12 = vmul.f32 -1.442695, %v3408_v61 }
 0x3df   :  { %3664 = vpow2.f32 %v2972_v29  ;;  %v2973_v44 = vmul.f32 -1.442695, %v3409_v37 }
 0x3e0   :  { %v3649_v47 = vpop.eup %3648  ;;  %3666 = vpow2.f32 %v2975_v12 }
 0x3e1   :  { %v3651_v3 = vpop.eup %3650  ;;  %v1634_v62 = vadd.f32 1.0, %v3649_v47  ;;  %3668 = vpow2.f32 %v2973_v44  ;;  %v3288_v5 = vpop.f32.mrb[24].mxu0 }
 0x3e2   :  { %v3653_v52 = vpop.eup %3652  ;;  %3670 = vrcp.f32 %v4447_v13  ;;  %v1632_v14 = vadd.f32 1.0, %v3651_v3  ;;  %v3410_v49 = vadd.f32 %v3288_v5, %v312_v41  ;;  %v1549_v20 = vpop.f32.mrb[25].mxu0 }
 0x3e3   :  { %v3655_v9 = vpop.eup %3654  ;;  %3672 = vrcp.f32 %v1634_v62  ;;  %v1635_v63 = vadd.f32 1.0, %v3653_v52  ;;  %v3411_v27 = vadd.f32 %v1549_v20, %v302_v54  ;;  %v3289_v50 = vpop.f32.mrb[26].mxu0 }
 0x3e4   :  { %3674 = vrcp.f32 %v1632_v14  ;;  %v1633_v58 = vadd.f32 1.0, %v3655_v9  ;;  %v2978_v60 = vmul.f32 -1.442695, %v3410_v49  ;;  %v3412_v1 = vadd.f32 %v3289_v50, %v317_v22  ;;  %v1552_v15 = vpop.f32.mrb[27].mxu0  ;;  %v3657_v61 = vpop.eup %3656 }
 0x3e5   :  { %3676 = vrcp.f32 %v1635_v63  ;;  %v2976_v18 = vmul.f32 -1.442695, %v3411_v27  ;;  %v3413_v29 = vadd.f32 %v1552_v15, %v307_v24  ;;  %v3659_v37 = vpop.eup %3658  ;;  %v332_v5 = vpop.permute.xlu0 %331 }
 0x3e6   :  { %3678 = vrcp.f32 %v1633_v58  ;;  %v2979_v13 = vmul.f32 -1.442695, %v3412_v1  ;;  %v3661_v12 = vpop.eup %3660  ;;  %v337_v63 = vpop.permute.xlu1 %336 }
 0x3e7   :  { %3680 = vpow2.f32 %v2978_v60  ;;  %v2977_v44 = vmul.f32 -1.442695, %v3413_v29 }
 0x3e8   :  { %v3663_v47 = vpop.eup %3662  ;;  %3682 = vpow2.f32 %v2976_v18 }
 0x3e9   :  { %v3665_v3 = vpop.eup %3664  ;;  %v1638_v54 = vadd.f32 1.0, %v3663_v47  ;;  %3684 = vpow2.f32 %v2979_v13  ;;  %v3292_v41 = vpop.f32.mrb[28].mxu0 }
 0x3ea   :  { %v3667_v62 = vpop.eup %3666  ;;  %v1636_v52 = vadd.f32 1.0, %v3665_v3  ;;  %3686 = vpow2.f32 %v2977_v44  ;;  %v1565_v14 = vpop.f32.mrb[29].mxu0  ;;  %v3414_v20 = vadd.f32 %v3292_v41, %v332_v5 }
 0x3eb   :  { %v3669_v49 = vpop.eup %3668  ;;  %3688 = vrcp.f32 %v1638_v54  ;;  %v1639_v24 = vadd.f32 1.0, %v3667_v62  ;;  %v3293_v9 = vpop.f32.mrb[30].mxu0  ;;  %v3415_v50 = vadd.f32 %v1565_v14, %v4481_v0  ;;  %v1399_v0 = vmul.f32 %v3657_v61, %v4395_v30 }
 0x3ec   :  { %v3671_v22 = vpop.eup %3670  ;;  %3690 = vrcp.f32 %v1636_v52  ;;  %v1637_v27 = vadd.f32 1.0, %v3669_v49  ;;  %v1568_v58 = vpop.f32.mrb[31].mxu0  ;;  %v3416_v1 = vadd.f32 %v3293_v9, %v337_v63  ;;  %v1397_v62 = vmul.f32 %v3659_v37, %v4397_v32 }
 0x3ed   :  { %v3673_v60 = vpop.eup %3672  ;;  %3692 = vrcp.f32 %v1639_v24  ;;  %v3417_v18 = vadd.f32 %v1568_v58, %v4485_v26  ;;  %v1400_v52 = vmul.f32 %v3661_v12, %v4399_v33  ;;  %v1398_v24 = vmul.f32 %v3671_v22, %v4404_v43 }
 0x3ee   :  { %v3675_v15 = vpop.eup %3674  ;;  %3694 = vrcp.f32 %v1637_v27 }
 0x3ef   :  { %v3677_v29 = vpop.eup %3676  ;;  %3696 = vtanh.f32 %v3414_v20 }
 0x3f0   :  { %v3679_v13 = vpop.eup %3678  ;;  %3698 = vtanh.f32 %v3415_v50 }
 0x3f1   :  { %v3681_v44 = vpop.eup %3680  ;;  %3700 = vtanh.f32 %v3416_v1 }
 0x3f2   :  { %v3683_v47 = vpop.eup %3682  ;;  %3702 = vtanh.f32 %v3417_v18  ;;  %v1642_v26 = vadd.f32 1.0, %v3681_v44 }
 0x3f3   :  { %v3685_v3 = vpop.eup %3684  ;;  %v1640_v9 = vadd.f32 1.0, %v3683_v47 }
 0x3f4   :  { %v3687_v54 = vpop.eup %3686  ;;  %v1643_v50 = vadd.f32 1.0, %v3685_v3  ;;  %3704 = vrcp.f32 %v1642_v26 }
 0x3f5   :  { %v3689_v41 = vpop.eup %3688  ;;  %v1641_v18 = vadd.f32 1.0, %v3687_v54  ;;  %3706 = vrcp.f32 %v1640_v9 }
 0x3f6   :  { %v3691_v5 = vpop.eup %3690  ;;  %v1674_v14 = vmul.f32 %v3689_v41, %v1399_v0  ;;  %3708 = vrcp.f32 %v1643_v50  ;;  %v3553_v50 = vld [vmem:[%s4720_s9 + $0x8] sm:$0xff]  }
 0x3f7   :  { %v3693_v49 = vpop.eup %3692  ;;  %v1672_v20 = vmul.f32 %v3691_v5, %v1397_v62  ;;  %3710 = vrcp.f32 %v1641_v18 }
 0x3f8   :  { %v3695_v63 = vpop.eup %3694  ;;  %v1675_v27 = vmul.f32 %v3693_v49, %v1400_v52 }
 0x3f9   :  { %v3697_v58 = vpop.eup %3696  ;;  %v1673_v1 = vmul.f32 %v3695_v63, %v1398_v24  ;;  %v3551_v63 = vld [vmem:[%s4719_s8 + $0x8] sm:$0xff]  }
 0x3fa   :  { %v3699_v30 = vpop.eup %3698  ;;  %v1678_v61 = vmul.f32 %v3697_v58, %v3673_v60  ;;  %v3554_v58 = vld [vmem:[%s4723_s12] sm:$0xff]  }
 0x3fb   :  { %v3701_v32 = vpop.eup %3700  ;;  %v1676_v37 = vmul.f32 %v3699_v30, %v3675_v15 }
 0x3fc   :  { %v3703_v33 = vpop.eup %3702  ;;  %v1682_v12 = vadd.f32 %v1678_v61, %v1674_v14  ;;  %v1679_v44 = vmul.f32 %v3701_v32, %v3677_v29 }
 0x3fd   :  { %v1680_v43 = vadd.f32 %v1676_v37, %v1672_v20  ;;  %v1677_v22 = vmul.f32 %v3703_v33, %v3679_v13 }
 0x3fe   :  { %3712 = vtanh.f32 %v1682_v12  ;;  %v1683_v47 = vadd.f32 %v1679_v44, %v1675_v27  ;;  %v3705_v41 = vpop.eup %3704  ;;  %v3552_v27 = vld [vmem:[%s4720_s9] sm:$0xff]  }
 0x3ff   :  { %3714 = vtanh.f32 %v1680_v43  ;;  %v1681_v3 = vadd.f32 %v1677_v22, %v1673_v1  ;;  %v3707_v60 = vpop.eup %3706 }
 0x400   :  { %3716 = vtanh.f32 %v1683_v47  ;;  %v1768_v0 = vpack.c.bf16 %v1683_v47, %v1682_v12  ;;  %v3709_v62 = vpop.eup %3708 }
 0x401   :  { %3718 = vtanh.f32 %v1681_v3  ;;  %v1767_v54 = vpack.c.bf16 %v1681_v3, %v1680_v43  ;;  %v3711_v5 = vpop.eup %3710 }
 0x408   :  { %v3713_v15 = vpop.eup %3712 }
 0x409   :  { %v3715_v52 = vpop.eup %3714  ;;  %v1690_v26 = vmul.f32 %v3713_v15, %v3705_v41 }
 0x40a   :  { %v3717_v14 = vpop.eup %3716  ;;  %v1688_v29 = vmul.f32 %v3715_v52, %v3707_v60 }
 0x40b   :  { %v3719_v49 = vpop.eup %3718  ;;  %v1691_v24 = vmul.f32 %v3717_v14, %v3709_v62 }
 0x40c   :  { %v1689_v13 = vmul.f32 %v3719_v49, %v3711_v5 }
 0x40d   :  { %v1697_v20 = vpack.c.bf16 %v1691_v24, %v1690_v26  ;;  %v3555_v24 = vld [vmem:[%s4723_s12 + $0x8] sm:$0xff]  }
 0x40e   :  { %v1696_v9 = vpack.c.bf16 %v1689_v13, %v1688_v29 }
 0x410   :  { %3294 = vmatprep.subr.bf16.mxu1 %v1696_v9 }
 0x411   :  { %3295 = vmatpush3.bf16.msra.mxu1 %v1696_v9 }
 0x412   :  { %3296 = vmatprep.subr.bf16.mxu1 %v1697_v20 }
 0x415   :  { %3297 = vmatpush3.bf16.msra.mxu1 %v1697_v20 }
 0x416   :  { %3302 = vmatprep.subr.bf16.mxu1 %v1767_v54 }
 0x418   :  { %3299 = vmatmul.mubr.msk.bf16.vlgmr.msra.gmra.mrb[48].mxu1 %vm659_vm0, %v3551_v63  ;;  %v3556_v63 = vld [vmem:[%s4715_s4] sm:$0xff]  }
 0x419   :  { %3303 = vmatpush3.bf16.msra.mxu1 %v1767_v54  ;;  %3306 = vmatprep.mubr.msk.bf16.mxu1 %vm659_vm0, %v3552_v27 }
 0x41a   :  { %3304 = vmatprep.subr.bf16.mxu1 %v1768_v0  ;;  %3330 = vmatprep.mubr.msk.bf16.mxu0 %vm659_vm0, %v3556_v63 }
 0x41d   :  { %3305 = vmatpush3.bf16.msra.mxu1 %v1768_v0 }
 0x420   :  { %3307 = vmatmul.mubr.msk.bf16.vlgmr.msra.gmra.mrb[52].mxu1 %vm659_vm0, %v3553_v50 }
 0x421   :  { %3314 = vmatprep.mubr.msk.bf16.mxu1 %vm659_vm0, %v3554_v58 }
 0x4eb   :  { %v3300_v1 = vpop.f32.mrb[48].mxu1 }
 0x4ec   :  { %v1748_v18 = vpop.f32.mrb[49].mxu1  ;;  %v1838_v33 = vmul.f32 1.442695, %v3300_v1 }
 0x4ed   :  { %v1834_v30 = vmul.f32 1.442695, %v1748_v18  ;;  %v3301_v61 = vpop.f32.mrb[50].mxu1 }
 0x4ee   :  { %v1840_v32 = vmul.f32 1.442695, %v3301_v61  ;;  %v1751_v37 = vpop.f32.mrb[51].mxu1 }
 0x4ef   :  { %3720 = vpow2.f32 %v1834_v30  ;;  %v1836_v12 = vmul.f32 1.442695, %v1751_v37 }
 0x4f0   :  { %3722 = vpow2.f32 %v1840_v32 }
 0x4f1   :  { %3724 = vpow2.f32 %v1836_v12 }
 0x4f2   :  { %3726 = vpow2.f32 %v1838_v33 }
 0x4f3   :  { %v3308_v44 = vpop.f32.mrb[52].mxu1 }
 0x4f4   :  { %v1846_v43 = vmul.f32 1.442695, %v3308_v44  ;;  %v1819_v22 = vpop.f32.mrb[53].mxu1 }
 0x4f5   :  { %v1842_v47 = vmul.f32 1.442695, %v1819_v22  ;;  %v3309_v3 = vpop.f32.mrb[54].mxu1 }
 0x4f6   :  { %3728 = vpow2.f32 %v1846_v43  ;;  %v1848_v0 = vmul.f32 1.442695, %v3309_v3  ;;  %v1822_v54 = vpop.f32.mrb[55].mxu1 }
 0x4f7   :  { %3730 = vpow2.f32 %v1842_v47  ;;  %v1844_v41 = vmul.f32 1.442695, %v1822_v54 }
 0x4f8   :  { %3732 = vpow2.f32 %v1848_v0 }
 0x4f9   :  { %v3721_v60 = vpop.eup %3720  ;;  %3734 = vpow2.f32 %v1844_v41  ;;  %v3557_v41 = vld [vmem:[%s4715_s4 + $0x8] sm:$0xff]  }
 0x4fa   :  { %v3723_v62 = vpop.eup %3722 }
 0x4fb   :  { %v3725_v5 = vpop.eup %3724 }
 0x4fc   :  { %v1854_v15 = vpack.c.bf16 %v3725_v5, %v3721_v60  ;;  %v3727_v52 = vpop.eup %3726 }
 0x4fd   :  { %v1855_v26 = vpack.c.bf16 %v3723_v62, %v3727_v52 }
 0x4fe   :  { %3310 = vmatprep.subr.bf16.mxu1 %v1854_v15 }
 0x4ff   :  { %3311 = vmatpush3.bf16.msra.mxu1 %v1854_v15  ;;  %v3558_v15 = vld [vmem:[%s4715_s4 + $0x10] sm:$0xff]  }
 0x500   :  { %v4511_v14 = vpop.eup %3728  ;;  %3312 = vmatprep.subr.bf16.mxu1 %v1855_v26 }
 0x501   :  { %v4513_v29 = vpop.eup %3730 }
 0x502   :  { %v4515_v49 = vpop.eup %3732 }
 0x503   :  { %v4520_v13 = vpop.eup %3734  ;;  %3313 = vmatpush3.bf16.msra.mxu1 %v1855_v26  ;;  %v1922_v9 = vpack.c.bf16 %v4515_v49, %v4511_v14  ;;  %v3563_v26 = vld [vmem:[%s4715_s4 + $0x38] sm:$0xff]  }
 0x504   :  { %v1921_v20 = vpack.c.bf16 %v4520_v13, %v4513_v29 }
 0x506   :  { %3315 = vmatmul.mubr.msk.bf16.vlgmr.msra.gmra.mrb[56].mxu1 %vm659_vm0, %v3555_v24  ;;  %3318 = vmatprep.subr.bf16.mxu1 %v1921_v20 }
 0x507   :  { %3319 = vmatpush3.bf16.msra.mxu1 %v1921_v20  ;;  %3322 = vmatprep.mubr.msk.bf16.mxu1 %vm659_vm0, %v3554_v58  ;;  %v342_v20 = vpop.permute.xlu0 %341 }
 0x508   :  { %3320 = vmatprep.subr.bf16.mxu1 %v1922_v9 }
 0x50b   :  { %3321 = vmatpush3.bf16.msra.mxu1 %v1922_v9  ;;  %v347_v9 = vpop.permute.xlu1 %346  ;;  %v362_v63 = vpop.permute.xlu0 %361 }
 0x50e   :  { %3323 = vmatmul.mubr.msk.bf16.vlgmr.msra.gmra.mrb[60].mxu1 %vm659_vm0, %v3555_v24  ;;  %v4572_v24 = vld [vmem:[%s4721_s10] sm:$0xff]  }
 0x50f   :  { %3350 = vmatprep.mubr.msk.bf16.mxu1 %vm659_vm0, %v4572_v24 }
 0x5d9   :  { %v3316_v27 = vpop.f32.mrb[56].mxu1 }
 0x5da   :  { %3736 = vrcp.f32 %v3316_v27  ;;  %v1906_v50 = vpop.f32.mrb[57].mxu1  ;;  %v367_v27 = vpop.permute.xlu1 %366 }
 0x5db   :  { %3738 = vrcp.f32 %v1906_v50  ;;  %v3317_v1 = vpop.f32.mrb[58].mxu1  ;;  %v352_v50 = vpop.permute.xlu0 %351 }
 0x5dc   :  { %3740 = vrcp.f32 %v3317_v1  ;;  %v1909_v18 = vpop.f32.mrb[59].mxu1 }
 0x5dd   :  { %3742 = vrcp.f32 %v1909_v18 }
 0x5de   :  { %v357_v1 = vpop.permute.xlu1 %356 }
 0x5df   :  { %v372_v18 = vpop.permute.xlu0 %371 }
 0x5e1   :  { %v4533_v30 = vpop.f32.mrb[60].mxu1 }
 0x5e2   :  { %v4535_v58 = vpop.f32.mrb[61].mxu1 }
 0x5e3   :  { %v4537_v61 = vpop.f32.mrb[62].mxu1 }
 0x5e4   :  { %v3737_v32 = vpop.eup %3736  ;;  %v4539_v37 = vpop.f32.mrb[63].mxu1 }
 0x5e5   :  { %v3739_v33 = vpop.eup %3738  ;;  %v1978_v43 = vmul.f32 %v3737_v32, %v3727_v52  ;;  %v3562_v52 = vld [vmem:[%s4715_s4 + $0x30] sm:$0xff]   ;;  %v377_v32 = vpop.permute.xlu1 %376 }
 0x5e6   :  { %v3741_v12 = vpop.eup %3740  ;;  %v1976_v47 = vmul.f32 %v3739_v33, %v3721_v60  ;;  %v3559_v60 = vld [vmem:[%s4715_s4 + $0x18] sm:$0xff]   ;;  %v923_v33 = vadd.f32 %v4307_v35, %v352_v50  ;;  %v931_v50 = vadd.f32 %v4317_v55, %v362_v63 }
 0x5e7   :  { %v3743_v44 = vpop.eup %3742  ;;  %v1979_v22 = vmul.f32 %v3741_v12, %v3723_v62  ;;  %v3560_v62 = vld [vmem:[%s4715_s4 + $0x20] sm:$0xff]   ;;  %v915_v12 = vadd.f32 %v4309_v38, %v342_v20  ;;  %v939_v20 = vadd.f32 %v4315_v53, %v372_v18 }
 0x5e8   :  { %v1977_v3 = vmul.f32 %v3743_v44, %v3725_v5  ;;  %v3561_v5 = vld [vmem:[%s4715_s4 + $0x28] sm:$0xff]  }
 0x5e9   :  { %v2005_v0 = vpack.c.bf16 %v1979_v22, %v1978_v43  ;;  %v926_v43 = vadd.f32 %v4311_v46, %v357_v1 }
 0x5ea   :  { %v2004_v54 = vpack.c.bf16 %v1977_v3, %v1976_v47  ;;  %v382_v3 = vpop.permute.xlu0 %381 }
 0x5ec   :  { %3326 = vmatprep.subr.bf16.mxu0 %v2004_v54 }
 0x5ed   :  { %3327 = vmatpush3.bf16.msra.mxu0 %v2004_v54 }
 0x5ee   :  { %3328 = vmatprep.subr.bf16.mxu0 %v2005_v0  ;;  %v4581_v46 = vpop.permute.xlu0 %401 }
 0x5f1   :  { %3329 = vmatpush3.bf16.msra.mxu0 %v2005_v0  ;;  %v918_v0 = vadd.f32 %v4313_v48, %v347_v9  ;;  %v942_v9 = vadd.f32 %v4319_v57, %v377_v32 }
 0x5f2   :  { %v392_v32 = vpop.permute.xlu0 %391 }
 0x5f4   :  { %3331 = vmatmul.mubr.msk.bf16.vlgmr.msra.gmra.mrb[32].mxu0 %vm659_vm0, %v3557_v41 }
 0x5f5   :  { %3334 = vmatprep.mubr.msk.bf16.mxu0 %vm659_vm0, %v3558_v15 }
 0x5fc   :  { %3335 = vmatmul.mubr.msk.bf16.gmra.mrb[36].mxu0 %vm659_vm0, %v3559_v60 }
 0x5fd   :  { %3338 = vmatprep.mubr.msk.bf16.mxu0 %vm659_vm0, %v3560_v62 }
 0x604   :  { %3339 = vmatmul.mubr.msk.bf16.gmra.mrb[40].mxu0 %vm659_vm0, %v3561_v5  ;;  %v387_v5 = vpop.permute.xlu1 %386 }
 0x605   :  { %3342 = vmatprep.mubr.msk.bf16.mxu0 %vm659_vm0, %v3562_v52 }
 0x60c   :  { %3343 = vmatmul.mubr.msk.bf16.gmra.mrb[44].mxu0 %vm659_vm0, %v3563_v26 }
 0x6c7   :  { %v3332_v44 = vpop.f32.mrb[32].mxu0 }
 0x6c8   :  { %v2169_v22 = vadd.f32 %v3332_v44, %v923_v33  ;;  %v2104_v47 = vpop.f32.mrb[33].mxu0  ;;  %v934_v44 = vadd.f32 %v4321_v59, %v367_v27  ;;  %v955_v59 = vadd.f32 %v4323_v2, %v392_v32 }
 0x6c9   :  { %v2167_v54 = vadd.f32 %v2104_v47, %v915_v12  ;;  %v3333_v41 = vpop.f32.mrb[34].mxu0  ;;  %v4585_v12 = vpop.permute.xlu1 %406 }
 0x6ca   :  { %v3012_v15 = vmul.f32 -1.442695, %v2169_v22  ;;  %v2170_v60 = vadd.f32 %v3333_v41, %v926_v43  ;;  %v2107_v62 = vpop.f32.mrb[35].mxu0 }
 0x6cb   :  { %v3010_v52 = vmul.f32 -1.442695, %v2167_v54  ;;  %v2168_v26 = vadd.f32 %v2107_v62, %v918_v0 }
 0x6cc   :  { %3744 = vpow2.f32 %v3012_v15  ;;  %v3013_v35 = vmul.f32 -1.442695, %v2170_v60 }
 0x6cd   :  { %3746 = vpow2.f32 %v3010_v52  ;;  %v3011_v38 = vmul.f32 -1.442695, %v2168_v26  ;;  %v397_v27 = vpop.permute.xlu1 %396 }
 0x6ce   :  { %3748 = vpow2.f32 %v3013_v35 }
 0x6cf   :  { %3750 = vpow2.f32 %v3011_v38  ;;  %v3336_v48 = vpop.f32.mrb[36].mxu0  ;;  %v950_v38 = vadd.f32 %v4329_v17, %v387_v5 }
 0x6d0   :  { %v2173_v1 = vadd.f32 %v3336_v48, %v939_v20  ;;  %v2120_v33 = vpop.f32.mrb[37].mxu0  ;;  %3752 = vrcp.f32 %v4533_v30 }
 0x6d1   :  { %v2171_v43 = vadd.f32 %v2120_v33, %v931_v50  ;;  %v3337_v22 = vpop.f32.mrb[38].mxu0  ;;  %3754 = vrcp.f32 %v4535_v58  ;;  %v947_v58 = vadd.f32 %v4325_v7, %v382_v3 }
 0x6d2   :  { %v3016_v53 = vmul.f32 -1.442695, %v2173_v1  ;;  %v2174_v18 = vadd.f32 %v3337_v22, %v942_v9  ;;  %v2123_v47 = vpop.f32.mrb[39].mxu0  ;;  %3756 = vrcp.f32 %v4537_v61  ;;  %v958_v61 = vadd.f32 %v4327_v11, %v397_v27  ;;  %v412_v22 = vpop.permute.xlu0 %411 }
 0x6d3   :  { %v3014_v55 = vmul.f32 -1.442695, %v2171_v43  ;;  %v2172_v63 = vadd.f32 %v2123_v47, %v934_v44  ;;  %v417_v47 = vpop.permute.xlu1 %416 }
 0x6d4   :  { %3758 = vpow2.f32 %v3016_v53  ;;  %v3017_v57 = vmul.f32 -1.442695, %v2174_v18  ;;  %v971_v53 = vadd.f32 %v4331_v25, %v412_v22  ;;  %v966_v25 = vadd.f32 %v4337_v34, %v4585_v12 }
 0x6d5   :  { %3760 = vpow2.f32 %v3014_v55  ;;  %v3015_v0 = vmul.f32 -1.442695, %v2172_v63  ;;  %v963_v55 = vadd.f32 %v4333_v28, %v4581_v46 }
 0x6d6   :  { %v3745_v54 = vpop.eup %3744  ;;  %3762 = vpow2.f32 %v3017_v57 }
 0x6d7   :  { %v3747_v30 = vpop.eup %3746  ;;  %v2221_v41 = vadd.f32 1.0, %v3745_v54  ;;  %3764 = vpow2.f32 %v3015_v0  ;;  %v3340_v15 = vpop.f32.mrb[40].mxu0  ;;  %v974_v0 = vadd.f32 %v4335_v31, %v417_v47 }
 0x6d8   :  { %v3749_v60 = vpop.eup %3748  ;;  %3766 = vrcp.f32 %v4539_v37  ;;  %v2219_v62 = vadd.f32 1.0, %v3747_v30  ;;  %v2177_v52 = vadd.f32 %v3340_v15, %v955_v59  ;;  %v2136_v26 = vpop.f32.mrb[41].mxu0 }
 0x6d9   :  { %v3751_v35 = vpop.eup %3750  ;;  %3768 = vrcp.f32 %v2221_v41  ;;  %v2222_v2 = vadd.f32 1.0, %v3749_v60  ;;  %v2175_v20 = vadd.f32 %v2136_v26, %v947_v58  ;;  %v3341_v50 = vpop.f32.mrb[42].mxu0 }
 0x6da   :  { %3770 = vrcp.f32 %v2219_v62  ;;  %v2220_v7 = vadd.f32 1.0, %v3751_v35  ;;  %v3020_v3 = vmul.f32 -1.442695, %v2177_v52  ;;  %v2178_v48 = vadd.f32 %v3341_v50, %v958_v61  ;;  %v2139_v9 = vpop.f32.mrb[43].mxu0  ;;  %v3753_v1 = vpop.eup %3752 }
 0x6db   :  { %3772 = vrcp.f32 %v2222_v2  ;;  %v3018_v11 = vmul.f32 -1.442695, %v2175_v20  ;;  %v2176_v33 = vadd.f32 %v2139_v9, %v950_v38  ;;  %v3755_v37 = vpop.eup %3754  ;;  %v1986_v20 = vmul.f32 %v3753_v1, %v4511_v14 }
 0x6dc   :  { %3774 = vrcp.f32 %v2220_v7  ;;  %v3021_v44 = vmul.f32 -1.442695, %v2178_v48  ;;  %v3757_v43 = vpop.eup %3756  ;;  %v1984_v7 = vmul.f32 %v3755_v37, %v4513_v29 }
 0x6dd   :  { %3776 = vpow2.f32 %v3020_v3  ;;  %v3019_v17 = vmul.f32 -1.442695, %v2176_v33  ;;  %v1987_v48 = vmul.f32 %v3757_v43, %v4515_v49 }
 0x6de   :  { %v3759_v5 = vpop.eup %3758  ;;  %3778 = vpow2.f32 %v3018_v11 }
 0x6df   :  { %v3761_v18 = vpop.eup %3760  ;;  %v2225_v63 = vadd.f32 1.0, %v3759_v5  ;;  %3780 = vpow2.f32 %v3021_v44  ;;  %v3344_v57 = vpop.f32.mrb[44].mxu0 }
 0x6e0   :  { %v3763_v32 = vpop.eup %3762  ;;  %v2223_v54 = vadd.f32 1.0, %v3761_v18  ;;  %3782 = vpow2.f32 %v3019_v17  ;;  %v2181_v59 = vadd.f32 %v3344_v57, %v971_v53  ;;  %v2152_v30 = vpop.f32.mrb[45].mxu0 }
 0x6e1   :  { %v3765_v27 = vpop.eup %3764  ;;  %3784 = vrcp.f32 %v2225_v63  ;;  %v2226_v58 = vadd.f32 1.0, %v3763_v32  ;;  %v2179_v41 = vadd.f32 %v2152_v30, %v963_v55  ;;  %v3345_v15 = vpop.f32.mrb[46].mxu0 }
 0x6e2   :  { %v3767_v60 = vpop.eup %3766  ;;  %3786 = vrcp.f32 %v2223_v54  ;;  %v2224_v28 = vadd.f32 1.0, %v3765_v27  ;;  %v2182_v46 = vadd.f32 %v3345_v15, %v974_v0  ;;  %v2155_v61 = vpop.f32.mrb[47].mxu0 }
 0x6e3   :  { %v3769_v62 = vpop.eup %3768  ;;  %3788 = vrcp.f32 %v2226_v58  ;;  %v2180_v31 = vadd.f32 %v2155_v61, %v966_v25  ;;  %v1985_v44 = vmul.f32 %v3767_v60, %v4520_v13 }
 0x6e4   :  { %v3771_v52 = vpop.eup %3770  ;;  %3790 = vrcp.f32 %v2224_v28 }
 0x6e5   :  { %v3773_v26 = vpop.eup %3772  ;;  %3792 = vtanh.f32 %v2181_v59 }
 0x6e6   :  { %v3775_v35 = vpop.eup %3774  ;;  %3794 = vtanh.f32 %v2179_v41 }
 0x6e7   :  { %v3777_v38 = vpop.eup %3776  ;;  %3796 = vtanh.f32 %v2182_v46 }
 0x6e8   :  { %v3779_v34 = vpop.eup %3778  ;;  %3798 = vtanh.f32 %v2180_v31  ;;  %v2229_v11 = vadd.f32 1.0, %v3777_v38  ;;  %v3565_v38 = vld [vmem:[%s4721_s10 + $0x8] sm:$0xff]  }
 0x6e9   :  { %v3781_v12 = vpop.eup %3780  ;;  %v2227_v17 = vadd.f32 1.0, %v3779_v34  ;;  %v3566_v34 = vld [vmem:[%s4724_s13] sm:$0xff]  }
 0x6ea   :  { %v3783_v2 = vpop.eup %3782  ;;  %v2230_v18 = vadd.f32 1.0, %v3781_v12  ;;  %3800 = vrcp.f32 %v2229_v11 }
 0x6eb   :  { %v3785_v50 = vpop.eup %3784  ;;  %v2228_v63 = vadd.f32 1.0, %v3783_v2  ;;  %3802 = vrcp.f32 %v2227_v17 }
 0x6ec   :  { %v3787_v3 = vpop.eup %3786  ;;  %v2261_v9 = vmul.f32 %v3785_v50, %v1986_v20  ;;  %3804 = vrcp.f32 %v2230_v18 }
 0x6ed   :  { %v3789_v33 = vpop.eup %3788  ;;  %v2259_v22 = vmul.f32 %v3787_v3, %v1984_v7  ;;  %3806 = vrcp.f32 %v2228_v63 }
 0x6ee   :  { %v3791_v5 = vpop.eup %3790  ;;  %v2262_v53 = vmul.f32 %v3789_v33, %v1987_v48 }
 0x6ef   :  { %v3793_v47 = vpop.eup %3792  ;;  %v2260_v55 = vmul.f32 %v3791_v5, %v1985_v44 }
 0x6f0   :  { %v3795_v14 = vpop.eup %3794  ;;  %v2265_v1 = vmul.f32 %v3793_v47, %v3769_v62 }
 0x6f1   :  { %v3797_v29 = vpop.eup %3796  ;;  %v2263_v37 = vmul.f32 %v3795_v14, %v3771_v52 }
 0x6f2   :  { %v3799_v49 = vpop.eup %3798  ;;  %v2269_v43 = vadd.f32 %v2265_v1, %v2261_v9  ;;  %v2266_v57 = vmul.f32 %v3797_v29, %v3773_v26 }
 0x6f3   :  { %v2267_v13 = vadd.f32 %v2263_v37, %v2259_v22  ;;  %v2264_v32 = vmul.f32 %v3799_v49, %v3775_v35 }
 0x6f4   :  { %3808 = vtanh.f32 %v2269_v43  ;;  %v2270_v0 = vadd.f32 %v2266_v57, %v2262_v53  ;;  %v3801_v27 = vpop.eup %3800 }
 0x6f5   :  { %3810 = vtanh.f32 %v2267_v13  ;;  %v2268_v54 = vadd.f32 %v2264_v32, %v2260_v55  ;;  %v3803_v25 = vpop.eup %3802 }
 0x6f6   :  { %3812 = vtanh.f32 %v2270_v0  ;;  %v2351_v59 = vpack.c.bf16 %v2270_v0, %v2269_v43  ;;  %v3805_v58 = vpop.eup %3804  ;;  %v3567_v43 = vld [vmem:[%s4724_s13 + $0x8] sm:$0xff]   ;;  %v3568_v0 = vld [vmem:[%s4716_s5] sm:$0xff]  }
 0x6f7   :  { %3814 = vtanh.f32 %v2268_v54  ;;  %v2350_v30 = vpack.c.bf16 %v2268_v54, %v2267_v13  ;;  %v3807_v41 = vpop.eup %3806  ;;  %3382 = vmatprep.mubr.msk.bf16.mxu0 %vm659_vm0, %v3568_v0 }
 0x6fe   :  { %v3809_v15 = vpop.eup %3808 }
 0x6ff   :  { %v3811_v60 = vpop.eup %3810  ;;  %v2277_v28 = vmul.f32 %v3809_v15, %v3801_v27 }
 0x700   :  { %v3813_v46 = vpop.eup %3812  ;;  %v2275_v61 = vmul.f32 %v3811_v60, %v3803_v25 }
 0x701   :  { %v3815_v62 = vpop.eup %3814  ;;  %v2278_v31 = vmul.f32 %v3813_v46, %v3805_v58 }
 0x702   :  { %v2276_v52 = vmul.f32 %v3815_v62, %v3807_v41 }
 0x703   :  { %v2284_v26 = vpack.c.bf16 %v2278_v31, %v2277_v28 }
 0x704   :  { %v2283_v35 = vpack.c.bf16 %v2276_v52, %v2275_v61 }
 0x706   :  { %3346 = vmatprep.subr.bf16.mxu1 %v2283_v35 }
 0x707   :  { %3347 = vmatpush3.bf16.msra.mxu1 %v2283_v35 }
 0x708   :  { %3348 = vmatprep.subr.bf16.mxu1 %v2284_v26 }
 0x70b   :  { %3349 = vmatpush3.bf16.msra.mxu1 %v2284_v26 }
 0x70c   :  { %3354 = vmatprep.subr.bf16.mxu1 %v2350_v30 }
 0x70e   :  { %3351 = vmatmul.mubr.msk.bf16.vlgmr.msra.gmra.mrb[64].mxu1 %vm659_vm0, %v3565_v38 }
 0x70f   :  { %3355 = vmatpush3.bf16.msra.mxu1 %v2350_v30  ;;  %3358 = vmatprep.mubr.msk.bf16.mxu1 %vm659_vm0, %v4572_v24 }
 0x710   :  { %3356 = vmatprep.subr.bf16.mxu1 %v2351_v59 }
 0x713   :  { %3357 = vmatpush3.bf16.msra.mxu1 %v2351_v59 }
 0x716   :  { %3359 = vmatmul.mubr.msk.bf16.vlgmr.msra.gmra.mrb[68].mxu1 %vm659_vm0, %v3565_v38 }
 0x717   :  { %3366 = vmatprep.mubr.msk.bf16.mxu1 %vm659_vm0, %v3566_v34 }
 0x7e1   :  { %v3352_v12 = vpop.f32.mrb[64].mxu1 }
 0x7e2   :  { %v2335_v2 = vpop.f32.mrb[65].mxu1  ;;  %v2405_v48 = vmul.f32 1.442695, %v3352_v12  ;;  %v3570_v12 = vld [vmem:[%s4716_s5 + $0x10] sm:$0xff]  }
 0x7e3   :  { %v2401_v20 = vmul.f32 1.442695, %v2335_v2  ;;  %v3353_v50 = vpop.f32.mrb[66].mxu1  ;;  %v3571_v2 = vld [vmem:[%s4716_s5 + $0x18] sm:$0xff]  }
 0x7e4   :  { %v2407_v7 = vmul.f32 1.442695, %v3353_v50  ;;  %v2338_v3 = vpop.f32.mrb[67].mxu1  ;;  %v3573_v50 = vld [vmem:[%s4716_s5 + $0x28] sm:$0xff]  }
 0x7e5   :  { %3816 = vpow2.f32 %v2401_v20  ;;  %v2403_v9 = vmul.f32 1.442695, %v2338_v3  ;;  %v3572_v20 = vld [vmem:[%s4716_s5 + $0x20] sm:$0xff]   ;;  %v3575_v3 = vld [vmem:[%s4716_s5 + $0x38] sm:$0xff]  }
 0x7e6   :  { %3818 = vpow2.f32 %v2407_v7  ;;  %v3574_v7 = vld [vmem:[%s4716_s5 + $0x30] sm:$0xff]  }
 0x7e7   :  { %3820 = vpow2.f32 %v2403_v9  ;;  %v427_v9 = vpop.permute.xlu1 %426 }
 0x7e8   :  { %3822 = vpow2.f32 %v2405_v48  ;;  %v422_v48 = vpop.permute.xlu0 %421 }
 0x7e9   :  { %v3360_v24 = vpop.f32.mrb[68].mxu1 }
 0x7ea   :  { %v2413_v11 = vmul.f32 1.442695, %v3360_v24  ;;  %v2386_v33 = vpop.f32.mrb[69].mxu1 }
 0x7eb   :  { %v2409_v44 = vmul.f32 1.442695, %v2386_v33  ;;  %v3361_v22 = vpop.f32.mrb[70].mxu1 }
 0x7ec   :  { %3824 = vpow2.f32 %v2413_v11  ;;  %v2415_v17 = vmul.f32 1.442695, %v3361_v22  ;;  %v2389_v5 = vpop.f32.mrb[71].mxu1  ;;  %v432_v24 = vpop.permute.xlu0 %431 }
 0x7ed   :  { %3826 = vpow2.f32 %v2409_v44  ;;  %v2411_v53 = vmul.f32 1.442695, %v2389_v5  ;;  %v437_v11 = vpop.permute.xlu1 %436 }
 0x7ee   :  { %3828 = vpow2.f32 %v2415_v17  ;;  %v987_v17 = vadd.f32 %v4339_v42, %v432_v24 }
 0x7ef   :  { %v3817_v18 = vpop.eup %3816  ;;  %3830 = vpow2.f32 %v2411_v53  ;;  %v979_v53 = vadd.f32 %v4341_v45, %v422_v48 }
 0x7f0   :  { %v3819_v47 = vpop.eup %3818  ;;  %v442_v33 = vpop.permute.xlu0 %441 }
 0x7f1   :  { %v3821_v55 = vpop.eup %3820  ;;  %v447_v44 = vpop.permute.xlu1 %446 }
 0x7f2   :  { %v2421_v63 = vpack.c.bf16 %v3821_v55, %v3817_v18  ;;  %v3823_v14 = vpop.eup %3822 }
 0x7f3   :  { %v2422_v1 = vpack.c.bf16 %v3819_v47, %v3823_v14 }
 0x7f4   :  { %3362 = vmatprep.subr.bf16.mxu1 %v2421_v63  ;;  %v452_v22 = vpop.permute.xlu0 %451 }
 0x7f5   :  { %3363 = vmatpush3.bf16.msra.mxu1 %v2421_v63  ;;  %v457_v5 = vpop.permute.xlu1 %456 }
 0x7f6   :  { %v4617_v29 = vpop.eup %3824  ;;  %3364 = vmatprep.subr.bf16.mxu1 %v2422_v1 }
 0x7f7   :  { %v4619_v37 = vpop.eup %3826 }
 0x7f8   :  { %v4621_v49 = vpop.eup %3828 }
 0x7f9   :  { %v4626_v57 = vpop.eup %3830  ;;  %3365 = vmatpush3.bf16.msra.mxu1 %v2422_v1  ;;  %v2489_v32 = vpack.c.bf16 %v4621_v49, %v4617_v29 }
 0x7fa   :  { %v2488_v13 = vpack.c.bf16 %v4626_v57, %v4619_v37 }
 0x7fc   :  { %3367 = vmatmul.mubr.msk.bf16.vlgmr.msra.gmra.mrb[72].mxu1 %vm659_vm0, %v3567_v43  ;;  %3370 = vmatprep.subr.bf16.mxu1 %v2488_v13 }
 0x7fd   :  { %3371 = vmatpush3.bf16.msra.mxu1 %v2488_v13  ;;  %3374 = vmatprep.mubr.msk.bf16.mxu1 %vm659_vm0, %v3566_v34  ;;  %v3569_v34 = vld [vmem:[%s4716_s5 + $0x8] sm:$0xff]   ;;  %s3937_s5 = smov [#allocation2]  }
 0x7fe   :  { %3372 = vmatprep.subr.bf16.mxu1 %v2489_v32  ;;  %s2855_s17 = sshll.u32 %s3937_s5, 4  ;;  %s2856_s17 = int_to_ptr.vmem [resolvable:$true] %s2855_s17 }
 0x7ff   :  { %s3912_s18 = scalar_lea.vmem %s2856_s17, 512  ;;  %p3917_p1 = scmp.lt.s32.totalorder %s2856_s17, %s2856_s17 }
 0x800   :  { %p3913_p0 = scmp.ne.s32.totalorder %s2856_s17, %s3912_s18  ;;  %p3918_p2 = scmp.lt.s32.totalorder %s3912_s18, %s3912_s18 }
 0x801   :  { %3373 = vmatpush3.bf16.msra.mxu1 %v2489_v32 }
 0x802   :  { %p3919_p3 = por %p3918_p2, %p3917_p1 }
 0x804   :  { %3375 = vmatmul.mubr.msk.bf16.vlgmr.msra.gmra.mrb[76].mxu1 %vm659_vm0, %v3567_v43  ;;  %p3920_p4 = pnand %p3919_p3, %p3913_p0 }
 0x8cf   :  { %v3368_v54 = vpop.f32.mrb[72].mxu1 }
 0x8d0   :  { %3832 = vrcp.f32 %v3368_v54  ;;  %v2473_v59 = vpop.f32.mrb[73].mxu1  ;;  %v462_v54 = vpop.permute.xlu0 %461 }
 0x8d1   :  { %3834 = vrcp.f32 %v2473_v59  ;;  %v3369_v30 = vpop.f32.mrb[74].mxu1 }
 0x8d2   :  { %3836 = vrcp.f32 %v3369_v30  ;;  %v2476_v27 = vpop.f32.mrb[75].mxu1 }
 0x8d3   :  { %3838 = vrcp.f32 %v2476_v27  ;;  %v467_v27 = vpop.permute.xlu1 %466 }
 0x8d7   :  { %v4639_v25 = vpop.f32.mrb[76].mxu1 }
 0x8d8   :  { %v4641_v58 = vpop.f32.mrb[77].mxu1 }
 0x8d9   :  { %v4643_v41 = vpop.f32.mrb[78].mxu1 }
 0x8da   :  { %v3833_v15 = vpop.eup %3832  ;;  %v4645_v60 = vpop.f32.mrb[79].mxu1 }
 0x8db   :  { %v3835_v28 = vpop.eup %3834  ;;  %v2545_v62 = vmul.f32 %v3833_v15, %v3823_v14  ;;  %v982_v14 = vadd.f32 %v4345_v56, %v427_v9  ;;  %v1003_v15 = vadd.f32 %v4347_v4, %v452_v22 }
 0x8dc   :  { %v3837_v46 = vpop.eup %3836  ;;  %v2543_v52 = vmul.f32 %v3835_v28, %v3817_v18  ;;  %v1006_v28 = vadd.f32 %v4351_v8, %v457_v5 }
 0x8dd   :  { %v3839_v61 = vpop.eup %3838  ;;  %v2546_v31 = vmul.f32 %v3837_v46, %v3819_v47  ;;  %v990_v47 = vadd.f32 %v4343_v51, %v437_v11  ;;  %v995_v51 = vadd.f32 %v4349_v6, %v442_v33 }
 0x8de   :  { %v2544_v26 = vmul.f32 %v3839_v61, %v3821_v55 }
 0x8df   :  { %v2572_v35 = vpack.c.bf16 %v2546_v31, %v2545_v62  ;;  %v472_v62 = vpop.permute.xlu0 %471  ;;  %v998_v31 = vadd.f32 %v4353_v10, %v447_v44 }
 0x8e0   :  { %v2571_v38 = vpack.c.bf16 %v2544_v26, %v2543_v52  ;;  %v1019_v10 = vadd.f32 %v4355_v16, %v472_v62  ;;  %v1014_v16 = vadd.f32 %v4361_v23, %v467_v27 }
 0x8e2   :  { %3378 = vmatprep.subr.bf16.mxu0 %v2571_v38 }
 0x8e3   :  { %3379 = vmatpush3.bf16.msra.mxu0 %v2571_v38 }
 0x8e4   :  { %3380 = vmatprep.subr.bf16.mxu0 %v2572_v35 }
 0x8e7   :  { %3381 = vmatpush3.bf16.msra.mxu0 %v2572_v35 }
 0x8ea   :  { %3383 = vmatmul.mubr.msk.bf16.vlgmr.msra.gmra.mrb[48].mxu0 %vm659_vm0, %v3569_v34  ;;  %v477_v34 = vpop.permute.xlu1 %476 }
 0x8eb   :  { %3386 = vmatprep.mubr.msk.bf16.mxu0 %vm659_vm0, %v3570_v12 }
 0x8ee   :  { %v487_v44 = vpop.permute.xlu1 %486 }
 0x8f2   :  { %3387 = vmatmul.mubr.msk.bf16.gmra.mrb[52].mxu0 %vm659_vm0, %v3571_v2 }
 0x8f3   :  { %3390 = vmatprep.mubr.msk.bf16.mxu0 %vm659_vm0, %v3572_v20 }
 0x8fa   :  { %3391 = vmatmul.mubr.msk.bf16.gmra.mrb[56].mxu0 %vm659_vm0, %v3573_v50  ;;  %v482_v50 = vpop.permute.xlu0 %481 }
 0x8fb   :  { %3394 = vmatprep.mubr.msk.bf16.mxu0 %vm659_vm0, %v3574_v7 }
 0x902   :  { %3395 = vmatmul.mubr.msk.bf16.gmra.mrb[60].mxu0 %vm659_vm0, %v3575_v3 }
 0x9bd   :  { %v3384_v18 = vpop.f32.mrb[48].mxu0 }
 0x9be   :  { %v2736_v55 = vadd.f32 %v3384_v18, %v987_v17  ;;  %v2671_v63 = vpop.f32.mrb[49].mxu0 }
 0x9bf   :  { %v2734_v1 = vadd.f32 %v2671_v63, %v979_v53  ;;  %v3385_v43 = vpop.f32.mrb[50].mxu0 }
 0x9c0   :  { %v3052_v13 = vmul.f32 -1.442695, %v2736_v55  ;;  %v2737_v32 = vadd.f32 %v3385_v43, %v990_v47  ;;  %v2674_v0 = vpop.f32.mrb[51].mxu0  ;;  %v492_v43 = vpop.permute.xlu0 %491 }
 0x9c1   :  { %v3050_v59 = vmul.f32 -1.442695, %v2734_v1  ;;  %v2735_v30 = vadd.f32 %v2674_v0, %v982_v14 }
 0x9c2   :  { %3840 = vpow2.f32 %v3052_v13  ;;  %v3053_v42 = vmul.f32 -1.442695, %v2737_v32  ;;  %v1035_v32 = vadd.f32 %v4363_v36, %v492_v43 }
 0x9c3   :  { %3842 = vpow2.f32 %v3050_v59  ;;  %v3051_v45 = vmul.f32 -1.442695, %v2735_v30  ;;  %v1027_v59 = vadd.f32 %v4365_v39, %v482_v50 }
 0x9c4   :  { %3844 = vpow2.f32 %v3053_v42 }
 0x9c5   :  { %3846 = vpow2.f32 %v3051_v45  ;;  %v3388_v56 = vpop.f32.mrb[52].mxu0 }
 0x9c6   :  { %v2740_v46 = vadd.f32 %v3388_v56, %v1003_v15  ;;  %v2687_v61 = vpop.f32.mrb[53].mxu0  ;;  %3848 = vrcp.f32 %v4639_v25 }
 0x9c7   :  { %v2738_v52 = vadd.f32 %v2687_v61, %v995_v51  ;;  %v3389_v26 = vpop.f32.mrb[54].mxu0  ;;  %3850 = vrcp.f32 %v4641_v58  ;;  %v1011_v58 = vadd.f32 %v4357_v19, %v462_v54  ;;  %v497_v54 = vpop.permute.xlu1 %496 }
 0x9c8   :  { %v3056_v35 = vmul.f32 -1.442695, %v2740_v46  ;;  %v2741_v4 = vadd.f32 %v3389_v26, %v1006_v28  ;;  %v2690_v38 = vpop.f32.mrb[55].mxu0  ;;  %3852 = vrcp.f32 %v4643_v41  ;;  %v1022_v41 = vadd.f32 %v4359_v21, %v477_v34  ;;  %v4727_v46 = vld [vmem:[#allocation5_spill] sm:$0xff] }
 0x9c9   :  { %v3054_v6 = vmul.f32 -1.442695, %v2738_v52  ;;  %v2739_v12 = vadd.f32 %v2690_v38, %v998_v31  ;;  %v1038_v45 = vadd.f32 %v4367_v40, %v497_v54  ;;  %v1030_v61 = vadd.f32 %v4727_v46, %v487_v44 }
 0x9ca   :  { %3854 = vpow2.f32 %v3056_v35  ;;  %v3057_v8 = vmul.f32 -1.442695, %v2741_v4 }
 0x9cb   :  { %3856 = vpow2.f32 %v3054_v6  ;;  %v3055_v2 = vmul.f32 -1.442695, %v2739_v12 }
 0x9cc   :  { %v3841_v20 = vpop.eup %3840  ;;  %3858 = vpow2.f32 %v3057_v8 }
 0x9cd   :  { %v3843_v25 = vpop.eup %3842  ;;  %v2788_v7 = vadd.f32 1.0, %v3841_v20  ;;  %3860 = vpow2.f32 %v3055_v2  ;;  %v3392_v3 = vpop.f32.mrb[56].mxu0 }
 0x9ce   :  { %v3845_v48 = vpop.eup %3844  ;;  %3862 = vrcp.f32 %v4645_v60  ;;  %v2786_v9 = vadd.f32 1.0, %v3843_v25  ;;  %v2744_v24 = vadd.f32 %v3392_v3, %v1019_v10  ;;  %v2703_v11 = vpop.f32.mrb[57].mxu0 }
 0x9cf   :  { %v3847_v33 = vpop.eup %3846  ;;  %3864 = vrcp.f32 %v2788_v7  ;;  %v2789_v22 = vadd.f32 1.0, %v3845_v48  ;;  %v2742_v17 = vadd.f32 %v2703_v11, %v1011_v58  ;;  %v3393_v5 = vpop.f32.mrb[58].mxu0 }
 0x9d0   :  { %3866 = vrcp.f32 %v2786_v9  ;;  %v2787_v19 = vadd.f32 1.0, %v3847_v33  ;;  %v3060_v53 = vmul.f32 -1.442695, %v2744_v24  ;;  %v2745_v18 = vadd.f32 %v3393_v5, %v1022_v41  ;;  %v2706_v47 = vpop.f32.mrb[59].mxu0  ;;  %v3849_v55 = vpop.eup %3848 }
 0x9d1   :  { %3868 = vrcp.f32 %v2789_v22  ;;  %v3058_v21 = vmul.f32 -1.442695, %v2742_v17  ;;  %v2743_v60 = vadd.f32 %v2706_v47, %v1014_v16  ;;  %v3851_v63 = vpop.eup %3850  ;;  %v2553_v10 = vmul.f32 %v3849_v55, %v4617_v29 }
 0x9d2   :  { %3870 = vrcp.f32 %v2787_v19  ;;  %v3061_v14 = vmul.f32 -1.442695, %v2745_v18  ;;  %v3853_v1 = vpop.eup %3852  ;;  %v2551_v50 = vmul.f32 %v3851_v63, %v4619_v37 }
 0x9d3   :  { %3872 = vpow2.f32 %v3060_v53  ;;  %v3059_v23 = vmul.f32 -1.442695, %v2743_v60  ;;  %v2554_v7 = vmul.f32 %v3853_v1, %v4621_v49 }
 0x9d4   :  { %v3855_v13 = vpop.eup %3854  ;;  %3874 = vpow2.f32 %v3058_v21 }
 0x9d5   :  { %v3857_v0 = vpop.eup %3856  ;;  %v2792_v30 = vadd.f32 1.0, %v3855_v13  ;;  %3876 = vpow2.f32 %v3061_v14  ;;  %v3396_v42 = vpop.f32.mrb[60].mxu0 }
 0x9d6   :  { %v3859_v27 = vpop.eup %3858  ;;  %v2790_v15 = vadd.f32 1.0, %v3857_v0  ;;  %3878 = vpow2.f32 %v3059_v23  ;;  %v2748_v51 = vadd.f32 %v3396_v42, %v1035_v32  ;;  %v2719_v56 = vpop.f32.mrb[61].mxu0 }
 0x9d7   :  { %v3861_v28 = vpop.eup %3860  ;;  %3880 = vrcp.f32 %v2792_v30  ;;  %v2793_v36 = vadd.f32 1.0, %v3859_v27  ;;  %v2746_v62 = vadd.f32 %v2719_v56, %v1027_v59  ;;  %v3397_v31 = vpop.f32.mrb[62].mxu0 }
 0x9d8   :  { %v3863_v52 = vpop.eup %3862  ;;  %3882 = vrcp.f32 %v2790_v15  ;;  %v2791_v39 = vadd.f32 1.0, %v3861_v28  ;;  %v2749_v26 = vadd.f32 %v3397_v31, %v1038_v45  ;;  %v2722_v35 = vpop.f32.mrb[63].mxu0 }
 0x9d9   :  { %v3865_v4 = vpop.eup %3864  ;;  %3884 = vrcp.f32 %v2793_v36  ;;  %v2747_v38 = vadd.f32 %v2722_v35, %v1030_v61  ;;  %v2552_v9 = vmul.f32 %v3863_v52, %v4626_v57 }
 0x9da   :  { %v3867_v40 = vpop.eup %3866  ;;  %3886 = vrcp.f32 %v2791_v39 }
 0x9db   :  { %v3869_v34 = vpop.eup %3868  ;;  %3888 = vtanh.f32 %v2748_v51 }
 0x9dc   :  { %v3871_v6 = vpop.eup %3870  ;;  %3890 = vtanh.f32 %v2746_v62 }
 0x9dd   :  { %v3873_v12 = vpop.eup %3872  ;;  %3892 = vtanh.f32 %v2749_v26 }
 0x9de   :  { %v3875_v8 = vpop.eup %3874  ;;  %3894 = vtanh.f32 %v2747_v38  ;;  %v2796_v48 = vadd.f32 1.0, %v3873_v12 }
 0x9df   :  { %v3877_v2 = vpop.eup %3876  ;;  %v2794_v11 = vadd.f32 1.0, %v3875_v8 }
 0x9e0   :  { %v3879_v20 = vpop.eup %3878  ;;  %v2797_v16 = vadd.f32 1.0, %v3877_v2  ;;  %3896 = vrcp.f32 %v2796_v48 }
 0x9e1   :  { %v3881_v25 = vpop.eup %3880  ;;  %v2795_v5 = vadd.f32 1.0, %v3879_v20  ;;  %3898 = vrcp.f32 %v2794_v11 }
 0x9e2   :  { %v3883_v58 = vpop.eup %3882  ;;  %v2828_v3 = vmul.f32 %v3881_v25, %v2553_v10  ;;  %3900 = vrcp.f32 %v2797_v16 }
 0x9e3   :  { %v3885_v41 = vpop.eup %3884  ;;  %v2826_v24 = vmul.f32 %v3883_v58, %v2551_v50  ;;  %3902 = vrcp.f32 %v2795_v5 }
 0x9e4   :  { %v3887_v33 = vpop.eup %3886  ;;  %v2829_v44 = vmul.f32 %v3885_v41, %v2554_v7 }
 0x9e5   :  { %v3889_v22 = vpop.eup %3888  ;;  %v2827_v17 = vmul.f32 %v3887_v33, %v2552_v9 }
 0x9e6   :  { %v3891_v29 = vpop.eup %3890  ;;  %v2832_v19 = vmul.f32 %v3889_v22, %v3865_v4 }
 0x9e7   :  { %v3893_v37 = vpop.eup %3892  ;;  %v2830_v53 = vmul.f32 %v3891_v29, %v3867_v40 }
 0x9e8   :  { %v3895_v49 = vpop.eup %3894  ;;  %v2836_v18 = vadd.f32 %v2832_v19, %v2828_v3  ;;  %v2833_v47 = vmul.f32 %v3893_v37, %v3869_v34 }
 0x9e9   :  { %v2834_v57 = vadd.f32 %v2830_v53, %v2826_v24  ;;  %v2831_v55 = vmul.f32 %v3895_v49, %v3871_v6 }
 0x9ea   :  { %3904 = vtanh.f32 %v2836_v18  ;;  %v2837_v21 = vadd.f32 %v2833_v47, %v2829_v44  ;;  %v3897_v63 = vpop.eup %3896 }
 0x9eb   :  { %3906 = vtanh.f32 %v2834_v57  ;;  %v2835_v60 = vadd.f32 %v2831_v55, %v2827_v17  ;;  %v3899_v14 = vpop.eup %3898 }
 0x9ec   :  { %3908 = vtanh.f32 %v2837_v21  ;;  %v3901_v1 = vpop.eup %3900 }
 0x9ed   :  { %3910 = vtanh.f32 %v2835_v60  ;;  %v3903_v43 = vpop.eup %3902 }
 0x9f4   :  { %v3905_v23 = vpop.eup %3904 }
 0x9f5   :  { %v3907_v13 = vpop.eup %3906  ;;  %v2844_v32 = vmul.f32 %v3905_v23, %v3897_v63 }
 0x9f6   :  { %v3909_v0 = vpop.eup %3908  ;;  %v2842_v54 = vmul.f32 %v3907_v13, %v3899_v14 }
 0x9f7   :  { %v3911_v59 = vpop.eup %3910  ;;  %v2845_v30 = vmul.f32 %v3909_v0, %v3901_v1  ;;  %2848 = vst [vmem:[#allocation2 + $0x10] sm:$0xff] %v2844_v32 }
 0x9f8   :  { %v2843_v42 = vmul.f32 %v3911_v59, %v3903_v43  ;;  %2846 = vst [vmem:[#allocation2] sm:$0xff] %v2842_v54 }
 0x9f9   :  { %2849 = vst [vmem:[#allocation2 + $0x18] sm:$0xff] %v2845_v30 }
 0x9fa   :  { %2847 = vst [vmem:[#allocation2 + $0x8] sm:$0xff] %v2843_v42 }
 0x9fb   :  { %3923 = shalt.err (!%p3920_p4)
}
 0x9fc   :  { %s3924_s2 = scalar_lea.hbm %s4725_s14, 512 }
 0x9fd   :  { %p3925_p5 = scmp.ne.s32.totalorder %s4725_s14, %s3924_s2  ;;  %p3928_p6 = scmp.lt.u32.totalorder %s3924_s2, %s4725_s14 }
 0x9ff   :  { %p3930_p7 = pnand %p3928_p6, %p3925_p5 }
 0xa01   :  { %3933 = shalt.err (!%p3930_p7)
}
 0xa02   :  { %s3938_s23 = smov 128   ;;  %s3939_s24 = smov 8  }
 0xa03   :  { %2861 = dma.vmem_to_hbm [thread:$0]  %s2856_s17, 512, %s4725_s14, [#allocation3], %s3938_s23, %s3938_s23, %s3939_s24  }
 0xa04   :  { %3934 = dma.done.wait [#allocation3], 512  }
 0xa05   :  { %3935 = vsyncadd [#allocation3], 4294966784 }
 0xa06   :  { %2865 = vsyncpa [#allocation3], 1 }

</bundles_post_ra>
